<compile_context>
chip_gen: v5e
topology: v5e:2x2
jax: 0.10.0
libtpu: 0.0.40
codegen_flags: <defaults>
</compile_context>

<pallas_src>
import functools
import numpy as np
import jax
import jax.numpy as jnp
from jax import lax
from jax.experimental import pallas as pl
from jax.experimental.pallas import tpu as pltpu


# ----------------------------- Fused kernel (one grid step per batch block) --------------------------------
def _fused_mha_kernel(x_ref, pos_ref, wqkv_ref, bqkv_ref, cw_ref, cb_ref,
                      wo_ref, bo_ref, cos_ref, sin_ref, o_ref, *, n_head, head_dim):
    Bblk, S, E = x_ref.shape
    H, D = n_head, head_dim
    half = D // 2
    M = Bblk * S
    C3 = 3 * E

    # ---- x + pos_emb (pos broadcast over the batch block); fold batch into the matmul M dim ----
    xb = (x_ref[...] + pos_ref[...]).reshape(M, E)                              # bf16 (M, E)

    # ---- QKV projection: one MXU matmul for the whole batch block (bf16 in / f32 acc) ----
    # the 1/sqrt(D) attention scale is pre-folded into the q columns of wqkv / bqkv / conv_b.
    qkv = jnp.dot(xb, wqkv_ref[...], preferred_element_type=jnp.float32)        # (M, 3E) f32
    qkv = qkv + bqkv_ref[...]

    # ---- causal depthwise conv, kernel=3: y[t] = w0*x[t-2] + w1*x[t-1] + w2*x[t] + b ----
    # shifts via pltpu.roll (XLU slot) + mask; the mask also stops leakage across batch rows.
    row = lax.broadcasted_iota(jnp.int32, (M, C3), 0)
    if Bblk > 1:
        row = row % S
    qkv_m1 = jnp.where(row >= 1, pltpu.roll(qkv, shift=1, axis=0), 0.0)
    qkv_m2 = jnp.where(row >= 2, pltpu.roll(qkv, shift=2, axis=0), 0.0)
    cw = cw_ref[...].astype(jnp.float32)                                        # (3, 3E)
    qkv = cw[0:1, :] * qkv_m2 + cw[1:2, :] * qkv_m1 + cw[2:3, :] * qkv + cb_ref[...]

    # ---- rotary for ALL heads at once on the full-width q / k sections ----
    # tables are (S, E): per-head layout [cos, cos] / [-sin, +sin], tiled H times over lanes.
    cos = cos_ref[...]
    sin = sin_ref[...]
    if Bblk > 1:
        cos = jnp.concatenate([cos] * Bblk, axis=0)                             # (M, E)
        sin = jnp.concatenate([sin] * Bblk, axis=0)
    col = lax.broadcasted_iota(jnp.int32, (M, E), 1)
    first_half = (col % D) < half

    def rope(t):
        # block-wise half-swap for every head with two full-width rolls + one select
        swapped = jnp.where(first_half,
                            pltpu.roll(t, shift=E - half, axis=1),   # picks t[:, j + half]
                            pltpu.roll(t, shift=half, axis=1))       # picks t[:, j - half]
        return t * cos + swapped * sin

    # hoisted bf16 casts (once, not per head)
    q_all = rope(qkv[:, 0 * E:1 * E]).astype(jnp.bfloat16)                      # (M, E), pre-scaled
    k_all = rope(qkv[:, 1 * E:2 * E]).astype(jnp.bfloat16)
    v_all = qkv[:, 2 * E:3 * E].astype(jnp.bfloat16)

    # causal mask shared by every (batch, head) pair
    r = lax.broadcasted_iota(jnp.int32, (S, S), 0)
    c = lax.broadcasted_iota(jnp.int32, (S, S), 1)
    causal = c <= r

    # ---- attention per (batch, head); head contexts gathered into ONE (M, E) buffer ----
    # TODO(synk): at large S/E this should become a KV-tiled online-softmax (flash) loop.
    ctx_rows = []
    for b in range(Bblk):
        rows = slice(b * S, (b + 1) * S)
        cols = []
        for h in range(H):
            hcols = slice(h * D, (h + 1) * D)
            q = q_all[rows, hcols]
            k = k_all[rows, hcols]
            v = v_all[rows, hcols]
            # contract last dims directly (no in-kernel transpose), bf16 in / f32 acc
            s = lax.dot_general(q, k, (((1,), (1,)), ((), ())),
                                preferred_element_type=jnp.float32)             # (S, S)
            s = jnp.where(causal, s, -jnp.inf)
            p = jnp.exp(s - s.max(axis=-1, keepdims=True))
            p = p * pl.reciprocal(p.sum(axis=-1, keepdims=True), approx=True)   # EUP slot
            cols.append(jnp.dot(p.astype(jnp.bfloat16), v,
                                preferred_element_type=jnp.float32))            # (S, D)
        ctx_rows.append(jnp.concatenate(cols, axis=1))                          # (S, E)
    ctx_all = ctx_rows[0] if Bblk == 1 else jnp.concatenate(ctx_rows, axis=0)   # (M, E) f32

    # ---- single fused output projection for the whole batch block (K = E, not K = D) ----
    out = jnp.dot(ctx_all.astype(jnp.bfloat16), wo_ref[...],
                  preferred_element_type=jnp.float32)                           # (M, E)
    out = out + bo_ref[...]
    o_ref[...] = out.reshape(Bblk, S, E).astype(o_ref.dtype)                    # one slab store


# ----------------------------- One-time parameter preparation (init) ---------------------------------------
def prepare_params(params, *, seq_len, n_head):
    """Pre-transpose weights, fold the 1/sqrt(D) query scale into Wqkv/b_qkv/conv_b, and build
    full-width rotary tables.  Called once at init so no host work / H2D traffic sits on the
    forward critical path."""
    C3, E = params["wqkv"].shape
    H = n_head
    D = E // H
    scale = 1.0 / np.sqrt(D)

    # q channels scaled, k/v channels untouched (rotary and the dwconv are linear, so folding
    # the scale into the q columns of the projection + both biases is exact).
    col_scale = np.ones((C3,), np.float32)
    col_scale[:E] = scale
    col_scale = jnp.asarray(col_scale)[None, :]                                  # (1, 3E)

    wqkv_t = (jnp.transpose(params["wqkv"]).astype(jnp.float32) * col_scale).astype(jnp.bfloat16)  # (E, 3E)
    bqkv = params["bqkv"].astype(jnp.float32) * col_scale                        # (1, 3E) f32
    conv_b = params["conv_b"].astype(jnp.float32) * col_scale                    # (1, 3E) f32
    wo_t = jnp.transpose(params["wo"]).astype(jnp.bfloat16)                      # (E, E)
    bo = params["bo"].astype(jnp.float32)                                        # (1, E) f32

    # rotary tables (flash_attn RotaryEmbedding, base=10000, interleaved=False, rotary_dim=D),
    # full width (S, E): per-head [cos, cos] / [-sin, +sin], tiled across all H heads.
    inv_freq = 1.0 / (10000.0 ** (np.arange(0, D, 2, dtype=np.float32) / D))     # (D/2,)
    freqs = np.outer(np.arange(seq_len, dtype=np.float32), inv_freq)             # (S, D/2)
    cos_d = np.concatenate([np.cos(freqs), np.cos(freqs)], axis=-1)              # (S, D)
    sin_d = np.concatenate([-np.sin(freqs), np.sin(freqs)], axis=-1)             # (S, D)
    cos = jnp.asarray(np.tile(cos_d, (1, H)), jnp.float32)                       # (S, E)
    sin = jnp.asarray(np.tile(sin_d, (1, H)), jnp.float32)                       # (S, E)

    return {"wqkv_t": wqkv_t, "bqkv": bqkv, "conv_w": params["conv_w"], "conv_b": conv_b,
            "wo_t": wo_t, "bo": bo, "cos": cos, "sin": sin}


def _pick_batch_block(B):
    """v5e/v6e have one TensorCore: collapse the batch grid (fatter M, fewer ~0.35us steps).
    v7x has two TensorCores: keep >= 2 parallel grid steps so both cores get work."""
    try:
        kind = jax.devices()[0].device_kind.lower()
    except Exception:
        kind = ""
    if "v7" in kind and B % 2 == 0:
        target = max(1, B // 2)
    else:
        target = B
    target = max(1, min(target, 8))          # keep per-step VMEM / live ranges bounded
    for bb in range(target, 0, -1):
        if B % bb == 0:
            return bb
    return 1


# ----------------------------- Wrapper --------------------------------------------------------------------
def flash_mha_forward(x, pos_emb, pos_dist_emb, prepared, *, n_head, batch_block=None):
    del pos_dist_emb  # unused by the torch module's forward
    B, S, E = x.shape
    H = n_head
    D = E // H
    C3 = 3 * E

    bb = _pick_batch_block(B) if batch_block is None else batch_block
    if B % bb != 0:
        bb = 1

    kernel = functools.partial(_fused_mha_kernel, n_head=H, head_dim=D)
    # NOTE: at realistic E, add pipeline_mode=pl.Buffered(1) to the constant-index weight/table
    # specs below (never refetched -> no need to double-buffer resident weights on v7x VMEM).
    return pl.pallas_call(
        kernel,
        out_shape=jax.ShapeDtypeStruct((B, S, E), jnp.bfloat16),
        grid=(B // bb,),
        in_specs=[
            pl.BlockSpec((bb, S, E), lambda i: (i, 0, 0)),    # x
            pl.BlockSpec((1, S, E), lambda i: (0, 0, 0)),     # pos_emb (broadcast over batch)
            pl.BlockSpec((E, C3), lambda i: (0, 0)),          # Wqkv^T (q cols pre-scaled, resident)
            pl.BlockSpec((1, C3), lambda i: (0, 0)),          # b_qkv  (f32, q cols pre-scaled)
            pl.BlockSpec((3, C3), lambda i: (0, 0)),          # conv weight (tap, channel)
            pl.BlockSpec((1, C3), lambda i: (0, 0)),          # conv bias (f32, q cols pre-scaled)
            pl.BlockSpec((E, E), lambda i: (0, 0)),           # Wo^T (resident)
            pl.BlockSpec((1, E), lambda i: (0, 0)),           # b_o (f32)
            pl.BlockSpec((S, E), lambda i: (0, 0)),           # cos table (full width)
            pl.BlockSpec((S, E), lambda i: (0, 0)),           # sin table (full width, signed)
        ],
        out_specs=pl.BlockSpec((bb, S, E), lambda i: (i, 0, 0)),
        compiler_params=pltpu.CompilerParams(dimension_semantics=("parallel",)),
    )(x, pos_emb, prepared["wqkv_t"], prepared["bqkv"], prepared["conv_w"],
      prepared["conv_b"], prepared["wo_t"], prepared["bo"], prepared["cos"], prepared["sin"])


# ----------------------------- Pure-JAX reference (same math) ----------------------------------------------
def _reference(x, pos_emb, params, *, n_head):
    B, S, E = x.shape
    H = n_head
    D = E // H
    xf = x.astype(jnp.float32) + pos_emb.astype(jnp.float32)
    qkv = xf @ params["wqkv"].astype(jnp.float32).T + params["bqkv"].astype(jnp.float32)
    pad = jnp.pad(qkv, ((0, 0), (2, 0), (0, 0)))
    cw = params["conv_w"].astype(jnp.float32)
    qkv = cw[0] * pad[:, :-2] + cw[1] * pad[:, 1:-1] + cw[2] * pad[:, 2:]
    qkv = (qkv + params["conv_b"].astype(jnp.float32)).astype(jnp.bfloat16)

    qkv5 = qkv.reshape(B, S, 3, H, D)
    q = jnp.transpose(qkv5[:, :, 0], (0, 2, 1, 3)).astype(jnp.float32)
    k = jnp.transpose(qkv5[:, :, 1], (0, 2, 1, 3)).astype(jnp.float32)
    v = jnp.transpose(qkv5[:, :, 2], (0, 2, 1, 3)).astype(jnp.float32)

    inv_freq = 1.0 / (10000.0 ** (np.arange(0, D, 2, dtype=np.float32) / D))
    freqs = np.outer(np.arange(S, dtype=np.float32), inv_freq)
    cos = jnp.asarray(np.cos(freqs), jnp.float32)[None, None]
    sin = jnp.asarray(np.sin(freqs), jnp.float32)[None, None]

    def rot(t):
        t1, t2 = t[..., : D // 2], t[..., D // 2:]
        return jnp.concatenate([t1 * cos - t2 * sin, t1 * sin + t2 * cos], axis=-1)

    q, k = rot(q), rot(k)
    s = jnp.einsum("bhqd,bhkd->bhqk", q, k) / (D ** 0.5)
    mask = np.tril(np.ones((S, S), dtype=bool))
    s = jnp.where(mask[None, None], s, -jnp.inf)
    p = jax.nn.softmax(s, axis=-1)
    ctx = jnp.einsum("bhqk,bhkd->bhqd", p, v).astype(jnp.bfloat16)
    ctx2 = jnp.transpose(ctx, (0, 2, 1, 3)).reshape(B * S, E).astype(jnp.float32)
    out = ctx2 @ params["wo"].astype(jnp.float32).T + params["bo"].astype(jnp.float32)
    return out.astype(jnp.bfloat16).reshape(B, S, E)


# ----------------------------- Main -------------------------------------------------------------------------
if __name__ == "__main__":
    # config: n_embed=32, n_head=4, head_size=8, seq=8, batch=2, precision=bfloat16, causal=True
    B, S, E, H = 2, 8, 32, 4
    D = E // H
    C3 = 3 * E

    key = jax.random.PRNGKey(0)
    ks = jax.random.split(key, 9)
    x = (jax.random.normal(ks[0], (B, S, E), jnp.float32)).astype(jnp.bfloat16)
    pos_emb = (0.1 * jax.random.normal(ks[1], (1, S, E), jnp.float32)).astype(jnp.bfloat16)
    pos_dist_emb = (0.1 * jax.random.normal(ks[2], (1, S, E), jnp.float32)).astype(jnp.bfloat16)  # unused

    params = {
        # Wqkv: Linear(E, 3E) -> weight (3E, E), bias (3E,) kept 2D for the kernel
        "wqkv": (0.02 * jax.random.normal(ks[3], (C3, E), jnp.float32)).astype(jnp.bfloat16),
        "bqkv": (0.02 * jax.random.normal(ks[4], (1, C3), jnp.float32)).astype(jnp.bfloat16),
        # dwconv: Conv1d(3E, 3E, k=3, groups=3E) -> weight (3E, 1, 3); stored as (tap, channel)
        "conv_w": (0.2 * jax.random.normal(ks[5], (3, C3), jnp.float32)).astype(jnp.bfloat16),
        "conv_b": (0.02 * jax.random.normal(ks[6], (1, C3), jnp.float32)).astype(jnp.bfloat16),
        # out_proj: Linear(E, E)
        "wo": (0.02 * jax.random.normal(ks[7], (E, E), jnp.float32)).astype(jnp.bfloat16),
        "bo": (0.02 * jax.random.normal(ks[8], (1, E), jnp.float32)).astype(jnp.bfloat16),
    }

    # one-time init: pre-scaled / pre-transposed weights + rotary tables
    prepared = prepare_params(params, seq_len=S, n_head=H)

    out = flash_mha_forward(x, pos_emb, pos_dist_emb, prepared, n_head=H)
    out = jax.block_until_ready(out)

    ref = _reference(x, pos_emb, params, n_head=H)
    np.testing.assert_allclose(
        np.asarray(out, dtype=np.float32), np.asarray(ref, dtype=np.float32),
        rtol=5e-2, atol=3e-3,
    )
    print("KERNEL_OK")
</pallas_src>

<mosaic_0001>
module attributes {stable_mosaic.version = 11 : i64} {
  func.func @_fused_mha_kernel(%arg0: i32, %arg1: memref<2x8x32xbf16, #tpu.memory_space<vmem>>, %arg2: memref<1x8x32xbf16, #tpu.memory_space<vmem>>, %arg3: memref<32x96xbf16, #tpu.memory_space<vmem>>, %arg4: memref<1x96xf32, #tpu.memory_space<vmem>>, %arg5: memref<3x96xbf16, #tpu.memory_space<vmem>>, %arg6: memref<1x96xf32, #tpu.memory_space<vmem>>, %arg7: memref<32x32xbf16, #tpu.memory_space<vmem>>, %arg8: memref<1x32xf32, #tpu.memory_space<vmem>>, %arg9: memref<8x32xf32, #tpu.memory_space<vmem>>, %arg10: memref<8x32xf32, #tpu.memory_space<vmem>>, %arg11: memref<2x8x32xbf16, #tpu.memory_space<vmem>>) attributes {dimension_semantics = [#tpu.dimension_semantics<parallel>], iteration_bounds = array<i64: 1>, scalar_prefetch = 0 : i64, scratch_operands = 0 : i64, tpu.core_type = #tpu.core_type<tc>, window_params = [{transform_indices = @transform_0, window_bounds = array<i64: 2, 8, 32>}, {pipeline_mode = #tpu.pipeline_mode<synchronous>, transform_indices = @transform_1, window_bounds = array<i64: 1, 8, 32>}, {pipeline_mode = #tpu.pipeline_mode<synchronous>, transform_indices = @transform_2, window_bounds = array<i64: 32, 96>}, {pipeline_mode = #tpu.pipeline_mode<synchronous>, transform_indices = @transform_3, window_bounds = array<i64: 1, 96>}, {pipeline_mode = #tpu.pipeline_mode<synchronous>, transform_indices = @transform_4, window_bounds = array<i64: 3, 96>}, {pipeline_mode = #tpu.pipeline_mode<synchronous>, transform_indices = @transform_5, window_bounds = array<i64: 1, 96>}, {pipeline_mode = #tpu.pipeline_mode<synchronous>, transform_indices = @transform_6, window_bounds = array<i64: 32, 32>}, {pipeline_mode = #tpu.pipeline_mode<synchronous>, transform_indices = @transform_7, window_bounds = array<i64: 1, 32>}, {pipeline_mode = #tpu.pipeline_mode<synchronous>, transform_indices = @transform_8, window_bounds = array<i64: 8, 32>}, {pipeline_mode = #tpu.pipeline_mode<synchronous>, transform_indices = @transform_9, window_bounds = array<i64: 8, 32>}, {transform_indices = @transform_10, window_bounds = array<i64: 2, 8, 32>}]} {
    %c0 = arith.constant 0 : index
    %c0_0 = arith.constant 0 : index
    %c0_1 = arith.constant 0 : index
    %0 = vector.load %arg1[%c0, %c0_0, %c0_1] : memref<2x8x32xbf16, #tpu.memory_space<vmem>>, vector<2x8x32xbf16>
    %c0_2 = arith.constant 0 : index
    %c0_3 = arith.constant 0 : index
    %c0_4 = arith.constant 0 : index
    %1 = vector.load %arg2[%c0_2, %c0_3, %c0_4] : memref<1x8x32xbf16, #tpu.memory_space<vmem>>, vector<1x8x32xbf16>
    %2 = vector.broadcast %1 : vector<1x8x32xbf16> to vector<2x8x32xbf16>
    %3 = arith.addf %0, %2 : vector<2x8x32xbf16>
    %4 = vector.shape_cast %3 : vector<2x8x32xbf16> to vector<16x32xbf16>
    %c0_5 = arith.constant 0 : index
    %c0_6 = arith.constant 0 : index
    %5 = vector.load %arg3[%c0_5, %c0_6] : memref<32x96xbf16, #tpu.memory_space<vmem>>, vector<32x96xbf16>
    %cst = arith.constant dense<0.000000e+00> : vector<16x96xf32>
    %6 = tpu.matmul %4, %5, %cst {dimension_numbers = #tpu.dot_dimension_numbers<[1], [0], [0], [1], [0, 0, 1, 1], [], []>} : vector<16x32xbf16>, vector<32x96xbf16>, vector<16x96xf32> -> vector<16x96xf32>
    %c0_7 = arith.constant 0 : index
    %c0_8 = arith.constant 0 : index
    %7 = vector.load %arg4[%c0_7, %c0_8] : memref<1x96xf32, #tpu.memory_space<vmem>>, vector<1x96xf32>
    %8 = vector.broadcast %7 : vector<1x96xf32> to vector<16x96xf32>
    %9 = arith.addf %6, %8 : vector<16x96xf32>
    %10 = tpu.iota {dimensions = array<i32: 0>} : vector<16x96xi32>
    %c8_i32 = arith.constant 8 : i32
    %c0_i32 = arith.constant 0 : i32
    %11 = arith.cmpi eq, %c8_i32, %c0_i32 : i32
    %c1_i32 = arith.constant 1 : i32
    %12 = arith.select %11, %c1_i32, %c8_i32 : i32
    %13 = vector.broadcast %12 : i32 to vector<16x96xi32>
    %14 = arith.remsi %10, %13 : vector<16x96xi32>
    %c0_i32_9 = arith.constant 0 : i32
    %15 = vector.broadcast %c0_i32_9 : i32 to vector<16x96xi32>
    %16 = arith.cmpi ne, %14, %15 : vector<16x96xi32>
    %c0_i32_10 = arith.constant 0 : i32
    %17 = vector.broadcast %c0_i32_10 : i32 to vector<16x96xi32>
    %18 = arith.cmpi slt, %14, %17 : vector<16x96xi32>
    %c0_i32_11 = arith.constant 0 : i32
    %19 = arith.cmpi slt, %12, %c0_i32_11 : i32
    %20 = vector.broadcast %19 : i1 to vector<16x96xi1>
    %21 = vector.broadcast %20 : vector<16x96xi1> to vector<16x96xi1>
    %22 = arith.xori %18, %21 : vector<16x96xi1>
    %23 = arith.andi %22, %16 : vector<16x96xi1>
    %24 = vector.broadcast %12 : i32 to vector<16x96xi32>
    %25 = arith.addi %14, %24 : vector<16x96xi32>
    %26 = arith.select %23, %25, %14 : vector<16x96xi1>, vector<16x96xi32>
    %c1_i32_12 = arith.constant 1 : i32
    %27 = vector.broadcast %c1_i32_12 : i32 to vector<16x96xi32>
    %28 = arith.cmpi sge, %26, %27 : vector<16x96xi32>
    %c1_i32_13 = arith.constant 1 : i32
    %29 = tpu.dynamic_rotate %9 by %c1_i32_13 dim 0 : vector<16x96xf32>, i32 -> vector<16x96xf32>
    %cst_14 = arith.constant 0.000000e+00 : f32
    %30 = vector.broadcast %cst_14 : f32 to vector<16x96xf32>
    %31 = arith.select %28, %29, %30 : vector<16x96xi1>, vector<16x96xf32>
    %c2_i32 = arith.constant 2 : i32
    %32 = vector.broadcast %c2_i32 : i32 to vector<16x96xi32>
    %33 = arith.cmpi sge, %26, %32 : vector<16x96xi32>
    %c2_i32_15 = arith.constant 2 : i32
    %34 = tpu.dynamic_rotate %9 by %c2_i32_15 dim 0 : vector<16x96xf32>, i32 -> vector<16x96xf32>
    %cst_16 = arith.constant 0.000000e+00 : f32
    %35 = vector.broadcast %cst_16 : f32 to vector<16x96xf32>
    %36 = arith.select %33, %34, %35 : vector<16x96xi1>, vector<16x96xf32>
    %c0_17 = arith.constant 0 : index
    %c0_18 = arith.constant 0 : index
    %37 = vector.load %arg5[%c0_17, %c0_18] : memref<3x96xbf16, #tpu.memory_space<vmem>>, vector<3x96xbf16>
    %38 = arith.extf %37 : vector<3x96xbf16> to vector<3x96xf32>
    %39 = vector.extract_strided_slice %38 {offsets = [0, 0], sizes = [1, 96], strides = [1, 1]} : vector<3x96xf32> to vector<1x96xf32>
    %40 = vector.broadcast %39 : vector<1x96xf32> to vector<16x96xf32>
    %41 = arith.mulf %40, %36 : vector<16x96xf32>
    %42 = vector.extract_strided_slice %38 {offsets = [1, 0], sizes = [1, 96], strides = [1, 1]} : vector<3x96xf32> to vector<1x96xf32>
    %43 = vector.broadcast %42 : vector<1x96xf32> to vector<16x96xf32>
    %44 = arith.mulf %43, %31 : vector<16x96xf32>
    %45 = arith.addf %41, %44 : vector<16x96xf32>
    %46 = vector.extract_strided_slice %38 {offsets = [2, 0], sizes = [1, 96], strides = [1, 1]} : vector<3x96xf32> to vector<1x96xf32>
    %47 = vector.broadcast %46 : vector<1x96xf32> to vector<16x96xf32>
    %48 = arith.mulf %47, %9 : vector<16x96xf32>
    %49 = arith.addf %45, %48 : vector<16x96xf32>
    %c0_19 = arith.constant 0 : index
    %c0_20 = arith.constant 0 : index
    %50 = vector.load %arg6[%c0_19, %c0_20] : memref<1x96xf32, #tpu.memory_space<vmem>>, vector<1x96xf32>
    %51 = vector.broadcast %50 : vector<1x96xf32> to vector<16x96xf32>
    %52 = arith.addf %49, %51 : vector<16x96xf32>
    %c0_21 = arith.constant 0 : index
    %c0_22 = arith.constant 0 : index
    %53 = vector.load %arg9[%c0_21, %c0_22] : memref<8x32xf32, #tpu.memory_space<vmem>>, vector<8x32xf32>
    %c0_23 = arith.constant 0 : index
    %c0_24 = arith.constant 0 : index
    %54 = vector.load %arg10[%c0_23, %c0_24] : memref<8x32xf32, #tpu.memory_space<vmem>>, vector<8x32xf32>
    %55 = tpu.concatenate %53, %53 in 0 : vector<8x32xf32>, vector<8x32xf32> -> vector<16x32xf32>
    %56 = tpu.concatenate %54, %54 in 0 : vector<8x32xf32>, vector<8x32xf32> -> vector<16x32xf32>
    %57 = tpu.iota {dimensions = array<i32: 1>} : vector<16x32xi32>
    %c8_i32_25 = arith.constant 8 : i32
    %c0_i32_26 = arith.constant 0 : i32
    %58 = arith.cmpi eq, %c8_i32_25, %c0_i32_26 : i32
    %c1_i32_27 = arith.constant 1 : i32
    %59 = arith.select %58, %c1_i32_27, %c8_i32_25 : i32
    %60 = vector.broadcast %59 : i32 to vector<16x32xi32>
    %61 = arith.remsi %57, %60 : vector<16x32xi32>
    %c0_i32_28 = arith.constant 0 : i32
    %62 = vector.broadcast %c0_i32_28 : i32 to vector<16x32xi32>
    %63 = arith.cmpi ne, %61, %62 : vector<16x32xi32>
    %c0_i32_29 = arith.constant 0 : i32
    %64 = vector.broadcast %c0_i32_29 : i32 to vector<16x32xi32>
    %65 = arith.cmpi slt, %61, %64 : vector<16x32xi32>
    %c0_i32_30 = arith.constant 0 : i32
    %66 = arith.cmpi slt, %59, %c0_i32_30 : i32
    %67 = vector.broadcast %66 : i1 to vector<16x32xi1>
    %68 = vector.broadcast %67 : vector<16x32xi1> to vector<16x32xi1>
    %69 = arith.xori %65, %68 : vector<16x32xi1>
    %70 = arith.andi %69, %63 : vector<16x32xi1>
    %71 = vector.broadcast %59 : i32 to vector<16x32xi32>
    %72 = arith.addi %61, %71 : vector<16x32xi32>
    %73 = arith.select %70, %72, %61 : vector<16x32xi1>, vector<16x32xi32>
    %c4_i32 = arith.constant 4 : i32
    %74 = vector.broadcast %c4_i32 : i32 to vector<16x32xi32>
    %75 = arith.cmpi slt, %73, %74 : vector<16x32xi32>
    %76 = vector.extract_strided_slice %52 {offsets = [0, 0], sizes = [16, 32], strides = [1, 1]} : vector<16x96xf32> to vector<16x32xf32>
    %c28_i32 = arith.constant 28 : i32
    %77 = tpu.dynamic_rotate %76 by %c28_i32 dim 1 : vector<16x32xf32>, i32 -> vector<16x32xf32>
    %c4_i32_31 = arith.constant 4 : i32
    %78 = tpu.dynamic_rotate %76 by %c4_i32_31 dim 1 : vector<16x32xf32>, i32 -> vector<16x32xf32>
    %79 = arith.select %75, %77, %78 : vector<16x32xi1>, vector<16x32xf32>
    %80 = arith.mulf %76, %55 : vector<16x32xf32>
    %81 = arith.mulf %79, %56 : vector<16x32xf32>
    %82 = arith.addf %80, %81 : vector<16x32xf32>
    %83 = arith.truncf %82 : vector<16x32xf32> to vector<16x32xbf16>
    %84 = vector.extract_strided_slice %52 {offsets = [0, 32], sizes = [16, 32], strides = [1, 1]} : vector<16x96xf32> to vector<16x32xf32>
    %c28_i32_32 = arith.constant 28 : i32
    %85 = tpu.dynamic_rotate %84 by %c28_i32_32 dim 1 : vector<16x32xf32>, i32 -> vector<16x32xf32>
    %c4_i32_33 = arith.constant 4 : i32
    %86 = tpu.dynamic_rotate %84 by %c4_i32_33 dim 1 : vector<16x32xf32>, i32 -> vector<16x32xf32>
    %87 = arith.select %75, %85, %86 : vector<16x32xi1>, vector<16x32xf32>
    %88 = arith.mulf %84, %55 : vector<16x32xf32>
    %89 = arith.mulf %87, %56 : vector<16x32xf32>
    %90 = arith.addf %88, %89 : vector<16x32xf32>
    %91 = arith.truncf %90 : vector<16x32xf32> to vector<16x32xbf16>
    %92 = vector.extract_strided_slice %52 {offsets = [0, 64], sizes = [16, 32], strides = [1, 1]} : vector<16x96xf32> to vector<16x32xf32>
    %93 = arith.truncf %92 : vector<16x32xf32> to vector<16x32xbf16>
    %94 = tpu.iota {dimensions = array<i32: 0>} : vector<8x8xi32>
    %95 = tpu.iota {dimensions = array<i32: 1>} : vector<8x8xi32>
    %96 = arith.cmpi sle, %95, %94 : vector<8x8xi32>
    %97 = vector.extract_strided_slice %83 {offsets = [0, 0], sizes = [8, 8], strides = [1, 1]} : vector<16x32xbf16> to vector<8x8xbf16>
    %98 = vector.extract_strided_slice %91 {offsets = [0, 0], sizes = [8, 8], strides = [1, 1]} : vector<16x32xbf16> to vector<8x8xbf16>
    %99 = vector.extract_strided_slice %93 {offsets = [0, 0], sizes = [8, 8], strides = [1, 1]} : vector<16x32xbf16> to vector<8x8xbf16>
    %cst_34 = arith.constant dense<0.000000e+00> : vector<8x8xf32>
    %100 = tpu.matmul %97, %98, %cst_34 {dimension_numbers = #tpu.dot_dimension_numbers<[1], [1], [0], [0], [0, 0, 1, 0], [], []>} : vector<8x8xbf16>, vector<8x8xbf16>, vector<8x8xf32> -> vector<8x8xf32>
    %cst_35 = arith.constant 0xFF800000 : f32
    %101 = vector.broadcast %cst_35 : f32 to vector<8x8xf32>
    %102 = arith.select %96, %100, %101 : vector<8x8xi1>, vector<8x8xf32>
    %cst_36 = arith.constant dense<0xFF800000> : vector<8xf32>
    %103 = vector.multi_reduction <maximumf>, %102, %cst_36 [1] : vector<8x8xf32> to vector<8xf32>
    %104 = vector.shape_cast %103 : vector<8xf32> to vector<8x1xf32>
    %105 = vector.broadcast %104 : vector<8x1xf32> to vector<8x8xf32>
    %106 = arith.subf %102, %105 : vector<8x8xf32>
    %107 = math.exp %106 : vector<8x8xf32>
    %cst_37 = arith.constant dense<0.000000e+00> : vector<8xf32>
    %108 = vector.multi_reduction <add>, %107, %cst_37 [1] : vector<8x8xf32> to vector<8xf32>
    %109 = vector.shape_cast %108 : vector<8xf32> to vector<8x1xf32>
    %110 = tpu.reciprocal %109 {approx = true} : vector<8x1xf32> -> vector<8x1xf32>
    %111 = vector.broadcast %110 : vector<8x1xf32> to vector<8x8xf32>
    %112 = arith.mulf %107, %111 : vector<8x8xf32>
    %113 = arith.truncf %112 : vector<8x8xf32> to vector<8x8xbf16>
    %cst_38 = arith.constant dense<0.000000e+00> : vector<8x8xf32>
    %114 = tpu.matmul %113, %99, %cst_38 {dimension_numbers = #tpu.dot_dimension_numbers<[1], [0], [0], [1], [0, 0, 1, 1], [], []>} : vector<8x8xbf16>, vector<8x8xbf16>, vector<8x8xf32> -> vector<8x8xf32>
    %115 = vector.extract_strided_slice %83 {offsets = [0, 8], sizes = [8, 8], strides = [1, 1]} : vector<16x32xbf16> to vector<8x8xbf16>
    %116 = vector.extract_strided_slice %91 {offsets = [0, 8], sizes = [8, 8], strides = [1, 1]} : vector<16x32xbf16> to vector<8x8xbf16>
    %117 = vector.extract_strided_slice %93 {offsets = [0, 8], sizes = [8, 8], strides = [1, 1]} : vector<16x32xbf16> to vector<8x8xbf16>
    %cst_39 = arith.constant dense<0.000000e+00> : vector<8x8xf32>
    %118 = tpu.matmul %115, %116, %cst_39 {dimension_numbers = #tpu.dot_dimension_numbers<[1], [1], [0], [0], [0, 0, 1, 0], [], []>} : vector<8x8xbf16>, vector<8x8xbf16>, vector<8x8xf32> -> vector<8x8xf32>
    %cst_40 = arith.constant 0xFF800000 : f32
    %119 = vector.broadcast %cst_40 : f32 to vector<8x8xf32>
    %120 = arith.select %96, %118, %119 : vector<8x8xi1>, vector<8x8xf32>
    %cst_41 = arith.constant dense<0xFF800000> : vector<8xf32>
    %121 = vector.multi_reduction <maximumf>, %120, %cst_41 [1] : vector<8x8xf32> to vector<8xf32>
    %122 = vector.shape_cast %121 : vector<8xf32> to vector<8x1xf32>
    %123 = vector.broadcast %122 : vector<8x1xf32> to vector<8x8xf32>
    %124 = arith.subf %120, %123 : vector<8x8xf32>
    %125 = math.exp %124 : vector<8x8xf32>
    %cst_42 = arith.constant dense<0.000000e+00> : vector<8xf32>
    %126 = vector.multi_reduction <add>, %125, %cst_42 [1] : vector<8x8xf32> to vector<8xf32>
    %127 = vector.shape_cast %126 : vector<8xf32> to vector<8x1xf32>
    %128 = tpu.reciprocal %127 {approx = true} : vector<8x1xf32> -> vector<8x1xf32>
    %129 = vector.broadcast %128 : vector<8x1xf32> to vector<8x8xf32>
    %130 = arith.mulf %125, %129 : vector<8x8xf32>
    %131 = arith.truncf %130 : vector<8x8xf32> to vector<8x8xbf16>
    %cst_43 = arith.constant dense<0.000000e+00> : vector<8x8xf32>
    %132 = tpu.matmul %131, %117, %cst_43 {dimension_numbers = #tpu.dot_dimension_numbers<[1], [0], [0], [1], [0, 0, 1, 1], [], []>} : vector<8x8xbf16>, vector<8x8xbf16>, vector<8x8xf32> -> vector<8x8xf32>
    %133 = vector.extract_strided_slice %83 {offsets = [0, 16], sizes = [8, 8], strides = [1, 1]} : vector<16x32xbf16> to vector<8x8xbf16>
    %134 = vector.extract_strided_slice %91 {offsets = [0, 16], sizes = [8, 8], strides = [1, 1]} : vector<16x32xbf16> to vector<8x8xbf16>
    %135 = vector.extract_strided_slice %93 {offsets = [0, 16], sizes = [8, 8], strides = [1, 1]} : vector<16x32xbf16> to vector<8x8xbf16>
    %cst_44 = arith.constant dense<0.000000e+00> : vector<8x8xf32>
    %136 = tpu.matmul %133, %134, %cst_44 {dimension_numbers = #tpu.dot_dimension_numbers<[1], [1], [0], [0], [0, 0, 1, 0], [], []>} : vector<8x8xbf16>, vector<8x8xbf16>, vector<8x8xf32> -> vector<8x8xf32>
    %cst_45 = arith.constant 0xFF800000 : f32
    %137 = vector.broadcast %cst_45 : f32 to vector<8x8xf32>
    %138 = arith.select %96, %136, %137 : vector<8x8xi1>, vector<8x8xf32>
    %cst_46 = arith.constant dense<0xFF800000> : vector<8xf32>
    %139 = vector.multi_reduction <maximumf>, %138, %cst_46 [1] : vector<8x8xf32> to vector<8xf32>
    %140 = vector.shape_cast %139 : vector<8xf32> to vector<8x1xf32>
    %141 = vector.broadcast %140 : vector<8x1xf32> to vector<8x8xf32>
    %142 = arith.subf %138, %141 : vector<8x8xf32>
    %143 = math.exp %142 : vector<8x8xf32>
    %cst_47 = arith.constant dense<0.000000e+00> : vector<8xf32>
    %144 = vector.multi_reduction <add>, %143, %cst_47 [1] : vector<8x8xf32> to vector<8xf32>
    %145 = vector.shape_cast %144 : vector<8xf32> to vector<8x1xf32>
    %146 = tpu.reciprocal %145 {approx = true} : vector<8x1xf32> -> vector<8x1xf32>
    %147 = vector.broadcast %146 : vector<8x1xf32> to vector<8x8xf32>
    %148 = arith.mulf %143, %147 : vector<8x8xf32>
    %149 = arith.truncf %148 : vector<8x8xf32> to vector<8x8xbf16>
    %cst_48 = arith.constant dense<0.000000e+00> : vector<8x8xf32>
    %150 = tpu.matmul %149, %135, %cst_48 {dimension_numbers = #tpu.dot_dimension_numbers<[1], [0], [0], [1], [0, 0, 1, 1], [], []>} : vector<8x8xbf16>, vector<8x8xbf16>, vector<8x8xf32> -> vector<8x8xf32>
    %151 = vector.extract_strided_slice %83 {offsets = [0, 24], sizes = [8, 8], strides = [1, 1]} : vector<16x32xbf16> to vector<8x8xbf16>
    %152 = vector.extract_strided_slice %91 {offsets = [0, 24], sizes = [8, 8], strides = [1, 1]} : vector<16x32xbf16> to vector<8x8xbf16>
    %153 = vector.extract_strided_slice %93 {offsets = [0, 24], sizes = [8, 8], strides = [1, 1]} : vector<16x32xbf16> to vector<8x8xbf16>
    %cst_49 = arith.constant dense<0.000000e+00> : vector<8x8xf32>
    %154 = tpu.matmul %151, %152, %cst_49 {dimension_numbers = #tpu.dot_dimension_numbers<[1], [1], [0], [0], [0, 0, 1, 0], [], []>} : vector<8x8xbf16>, vector<8x8xbf16>, vector<8x8xf32> -> vector<8x8xf32>
    %cst_50 = arith.constant 0xFF800000 : f32
    %155 = vector.broadcast %cst_50 : f32 to vector<8x8xf32>
    %156 = arith.select %96, %154, %155 : vector<8x8xi1>, vector<8x8xf32>
    %cst_51 = arith.constant dense<0xFF800000> : vector<8xf32>
    %157 = vector.multi_reduction <maximumf>, %156, %cst_51 [1] : vector<8x8xf32> to vector<8xf32>
    %158 = vector.shape_cast %157 : vector<8xf32> to vector<8x1xf32>
    %159 = vector.broadcast %158 : vector<8x1xf32> to vector<8x8xf32>
    %160 = arith.subf %156, %159 : vector<8x8xf32>
    %161 = math.exp %160 : vector<8x8xf32>
    %cst_52 = arith.constant dense<0.000000e+00> : vector<8xf32>
    %162 = vector.multi_reduction <add>, %161, %cst_52 [1] : vector<8x8xf32> to vector<8xf32>
    %163 = vector.shape_cast %162 : vector<8xf32> to vector<8x1xf32>
    %164 = tpu.reciprocal %163 {approx = true} : vector<8x1xf32> -> vector<8x1xf32>
    %165 = vector.broadcast %164 : vector<8x1xf32> to vector<8x8xf32>
    %166 = arith.mulf %161, %165 : vector<8x8xf32>
    %167 = arith.truncf %166 : vector<8x8xf32> to vector<8x8xbf16>
    %cst_53 = arith.constant dense<0.000000e+00> : vector<8x8xf32>
    %168 = tpu.matmul %167, %153, %cst_53 {dimension_numbers = #tpu.dot_dimension_numbers<[1], [0], [0], [1], [0, 0, 1, 1], [], []>} : vector<8x8xbf16>, vector<8x8xbf16>, vector<8x8xf32> -> vector<8x8xf32>
    %169 = tpu.concatenate %114, %132, %150, %168 in 1 : vector<8x8xf32>, vector<8x8xf32>, vector<8x8xf32>, vector<8x8xf32> -> vector<8x32xf32>
    %170 = vector.extract_strided_slice %83 {offsets = [8, 0], sizes = [8, 8], strides = [1, 1]} : vector<16x32xbf16> to vector<8x8xbf16>
    %171 = vector.extract_strided_slice %91 {offsets = [8, 0], sizes = [8, 8], strides = [1, 1]} : vector<16x32xbf16> to vector<8x8xbf16>
    %172 = vector.extract_strided_slice %93 {offsets = [8, 0], sizes = [8, 8], strides = [1, 1]} : vector<16x32xbf16> to vector<8x8xbf16>
    %cst_54 = arith.constant dense<0.000000e+00> : vector<8x8xf32>
    %173 = tpu.matmul %170, %171, %cst_54 {dimension_numbers = #tpu.dot_dimension_numbers<[1], [1], [0], [0], [0, 0, 1, 0], [], []>} : vector<8x8xbf16>, vector<8x8xbf16>, vector<8x8xf32> -> vector<8x8xf32>
    %cst_55 = arith.constant 0xFF800000 : f32
    %174 = vector.broadcast %cst_55 : f32 to vector<8x8xf32>
    %175 = arith.select %96, %173, %174 : vector<8x8xi1>, vector<8x8xf32>
    %cst_56 = arith.constant dense<0xFF800000> : vector<8xf32>
    %176 = vector.multi_reduction <maximumf>, %175, %cst_56 [1] : vector<8x8xf32> to vector<8xf32>
    %177 = vector.shape_cast %176 : vector<8xf32> to vector<8x1xf32>
    %178 = vector.broadcast %177 : vector<8x1xf32> to vector<8x8xf32>
    %179 = arith.subf %175, %178 : vector<8x8xf32>
    %180 = math.exp %179 : vector<8x8xf32>
    %cst_57 = arith.constant dense<0.000000e+00> : vector<8xf32>
    %181 = vector.multi_reduction <add>, %180, %cst_57 [1] : vector<8x8xf32> to vector<8xf32>
    %182 = vector.shape_cast %181 : vector<8xf32> to vector<8x1xf32>
    %183 = tpu.reciprocal %182 {approx = true} : vector<8x1xf32> -> vector<8x1xf32>
    %184 = vector.broadcast %183 : vector<8x1xf32> to vector<8x8xf32>
    %185 = arith.mulf %180, %184 : vector<8x8xf32>
    %186 = arith.truncf %185 : vector<8x8xf32> to vector<8x8xbf16>
    %cst_58 = arith.constant dense<0.000000e+00> : vector<8x8xf32>
    %187 = tpu.matmul %186, %172, %cst_58 {dimension_numbers = #tpu.dot_dimension_numbers<[1], [0], [0], [1], [0, 0, 1, 1], [], []>} : vector<8x8xbf16>, vector<8x8xbf16>, vector<8x8xf32> -> vector<8x8xf32>
    %188 = vector.extract_strided_slice %83 {offsets = [8, 8], sizes = [8, 8], strides = [1, 1]} : vector<16x32xbf16> to vector<8x8xbf16>
    %189 = vector.extract_strided_slice %91 {offsets = [8, 8], sizes = [8, 8], strides = [1, 1]} : vector<16x32xbf16> to vector<8x8xbf16>
    %190 = vector.extract_strided_slice %93 {offsets = [8, 8], sizes = [8, 8], strides = [1, 1]} : vector<16x32xbf16> to vector<8x8xbf16>
    %cst_59 = arith.constant dense<0.000000e+00> : vector<8x8xf32>
    %191 = tpu.matmul %188, %189, %cst_59 {dimension_numbers = #tpu.dot_dimension_numbers<[1], [1], [0], [0], [0, 0, 1, 0], [], []>} : vector<8x8xbf16>, vector<8x8xbf16>, vector<8x8xf32> -> vector<8x8xf32>
    %cst_60 = arith.constant 0xFF800000 : f32
    %192 = vector.broadcast %cst_60 : f32 to vector<8x8xf32>
    %193 = arith.select %96, %191, %192 : vector<8x8xi1>, vector<8x8xf32>
    %cst_61 = arith.constant dense<0xFF800000> : vector<8xf32>
    %194 = vector.multi_reduction <maximumf>, %193, %cst_61 [1] : vector<8x8xf32> to vector<8xf32>
    %195 = vector.shape_cast %194 : vector<8xf32> to vector<8x1xf32>
    %196 = vector.broadcast %195 : vector<8x1xf32> to vector<8x8xf32>
    %197 = arith.subf %193, %196 : vector<8x8xf32>
    %198 = math.exp %197 : vector<8x8xf32>
    %cst_62 = arith.constant dense<0.000000e+00> : vector<8xf32>
    %199 = vector.multi_reduction <add>, %198, %cst_62 [1] : vector<8x8xf32> to vector<8xf32>
    %200 = vector.shape_cast %199 : vector<8xf32> to vector<8x1xf32>
    %201 = tpu.reciprocal %200 {approx = true} : vector<8x1xf32> -> vector<8x1xf32>
    %202 = vector.broadcast %201 : vector<8x1xf32> to vector<8x8xf32>
    %203 = arith.mulf %198, %202 : vector<8x8xf32>
    %204 = arith.truncf %203 : vector<8x8xf32> to vector<8x8xbf16>
    %cst_63 = arith.constant dense<0.000000e+00> : vector<8x8xf32>
    %205 = tpu.matmul %204, %190, %cst_63 {dimension_numbers = #tpu.dot_dimension_numbers<[1], [0], [0], [1], [0, 0, 1, 1], [], []>} : vector<8x8xbf16>, vector<8x8xbf16>, vector<8x8xf32> -> vector<8x8xf32>
    %206 = vector.extract_strided_slice %83 {offsets = [8, 16], sizes = [8, 8], strides = [1, 1]} : vector<16x32xbf16> to vector<8x8xbf16>
    %207 = vector.extract_strided_slice %91 {offsets = [8, 16], sizes = [8, 8], strides = [1, 1]} : vector<16x32xbf16> to vector<8x8xbf16>
    %208 = vector.extract_strided_slice %93 {offsets = [8, 16], sizes = [8, 8], strides = [1, 1]} : vector<16x32xbf16> to vector<8x8xbf16>
    %cst_64 = arith.constant dense<0.000000e+00> : vector<8x8xf32>
    %209 = tpu.matmul %206, %207, %cst_64 {dimension_numbers = #tpu.dot_dimension_numbers<[1], [1], [0], [0], [0, 0, 1, 0], [], []>} : vector<8x8xbf16>, vector<8x8xbf16>, vector<8x8xf32> -> vector<8x8xf32>
    %cst_65 = arith.constant 0xFF800000 : f32
    %210 = vector.broadcast %cst_65 : f32 to vector<8x8xf32>
    %211 = arith.select %96, %209, %210 : vector<8x8xi1>, vector<8x8xf32>
    %cst_66 = arith.constant dense<0xFF800000> : vector<8xf32>
    %212 = vector.multi_reduction <maximumf>, %211, %cst_66 [1] : vector<8x8xf32> to vector<8xf32>
    %213 = vector.shape_cast %212 : vector<8xf32> to vector<8x1xf32>
    %214 = vector.broadcast %213 : vector<8x1xf32> to vector<8x8xf32>
    %215 = arith.subf %211, %214 : vector<8x8xf32>
    %216 = math.exp %215 : vector<8x8xf32>
    %cst_67 = arith.constant dense<0.000000e+00> : vector<8xf32>
    %217 = vector.multi_reduction <add>, %216, %cst_67 [1] : vector<8x8xf32> to vector<8xf32>
    %218 = vector.shape_cast %217 : vector<8xf32> to vector<8x1xf32>
    %219 = tpu.reciprocal %218 {approx = true} : vector<8x1xf32> -> vector<8x1xf32>
    %220 = vector.broadcast %219 : vector<8x1xf32> to vector<8x8xf32>
    %221 = arith.mulf %216, %220 : vector<8x8xf32>
    %222 = arith.truncf %221 : vector<8x8xf32> to vector<8x8xbf16>
    %cst_68 = arith.constant dense<0.000000e+00> : vector<8x8xf32>
    %223 = tpu.matmul %222, %208, %cst_68 {dimension_numbers = #tpu.dot_dimension_numbers<[1], [0], [0], [1], [0, 0, 1, 1], [], []>} : vector<8x8xbf16>, vector<8x8xbf16>, vector<8x8xf32> -> vector<8x8xf32>
    %224 = vector.extract_strided_slice %83 {offsets = [8, 24], sizes = [8, 8], strides = [1, 1]} : vector<16x32xbf16> to vector<8x8xbf16>
    %225 = vector.extract_strided_slice %91 {offsets = [8, 24], sizes = [8, 8], strides = [1, 1]} : vector<16x32xbf16> to vector<8x8xbf16>
    %226 = vector.extract_strided_slice %93 {offsets = [8, 24], sizes = [8, 8], strides = [1, 1]} : vector<16x32xbf16> to vector<8x8xbf16>
    %cst_69 = arith.constant dense<0.000000e+00> : vector<8x8xf32>
    %227 = tpu.matmul %224, %225, %cst_69 {dimension_numbers = #tpu.dot_dimension_numbers<[1], [1], [0], [0], [0, 0, 1, 0], [], []>} : vector<8x8xbf16>, vector<8x8xbf16>, vector<8x8xf32> -> vector<8x8xf32>
    %cst_70 = arith.constant 0xFF800000 : f32
    %228 = vector.broadcast %cst_70 : f32 to vector<8x8xf32>
    %229 = arith.select %96, %227, %228 : vector<8x8xi1>, vector<8x8xf32>
    %cst_71 = arith.constant dense<0xFF800000> : vector<8xf32>
    %230 = vector.multi_reduction <maximumf>, %229, %cst_71 [1] : vector<8x8xf32> to vector<8xf32>
    %231 = vector.shape_cast %230 : vector<8xf32> to vector<8x1xf32>
    %232 = vector.broadcast %231 : vector<8x1xf32> to vector<8x8xf32>
    %233 = arith.subf %229, %232 : vector<8x8xf32>
    %234 = math.exp %233 : vector<8x8xf32>
    %cst_72 = arith.constant dense<0.000000e+00> : vector<8xf32>
    %235 = vector.multi_reduction <add>, %234, %cst_72 [1] : vector<8x8xf32> to vector<8xf32>
    %236 = vector.shape_cast %235 : vector<8xf32> to vector<8x1xf32>
    %237 = tpu.reciprocal %236 {approx = true} : vector<8x1xf32> -> vector<8x1xf32>
    %238 = vector.broadcast %237 : vector<8x1xf32> to vector<8x8xf32>
    %239 = arith.mulf %234, %238 : vector<8x8xf32>
    %240 = arith.truncf %239 : vector<8x8xf32> to vector<8x8xbf16>
    %cst_73 = arith.constant dense<0.000000e+00> : vector<8x8xf32>
    %241 = tpu.matmul %240, %226, %cst_73 {dimension_numbers = #tpu.dot_dimension_numbers<[1], [0], [0], [1], [0, 0, 1, 1], [], []>} : vector<8x8xbf16>, vector<8x8xbf16>, vector<8x8xf32> -> vector<8x8xf32>
    %242 = tpu.concatenate %187, %205, %223, %241 in 1 : vector<8x8xf32>, vector<8x8xf32>, vector<8x8xf32>, vector<8x8xf32> -> vector<8x32xf32>
    %243 = tpu.concatenate %169, %242 in 0 : vector<8x32xf32>, vector<8x32xf32> -> vector<16x32xf32>
    %244 = arith.truncf %243 : vector<16x32xf32> to vector<16x32xbf16>
    %c0_74 = arith.constant 0 : index
    %c0_75 = arith.constant 0 : index
    %245 = vector.load %arg7[%c0_74, %c0_75] : memref<32x32xbf16, #tpu.memory_space<vmem>>, vector<32x32xbf16>
    %cst_76 = arith.constant dense<0.000000e+00> : vector<16x32xf32>
    %246 = tpu.matmul %244, %245, %cst_76 {dimension_numbers = #tpu.dot_dimension_numbers<[1], [0], [0], [1], [0, 0, 1, 1], [], []>} : vector<16x32xbf16>, vector<32x32xbf16>, vector<16x32xf32> -> vector<16x32xf32>
    %c0_77 = arith.constant 0 : index
    %c0_78 = arith.constant 0 : index
    %247 = vector.load %arg8[%c0_77, %c0_78] : memref<1x32xf32, #tpu.memory_space<vmem>>, vector<1x32xf32>
    %248 = vector.broadcast %247 : vector<1x32xf32> to vector<16x32xf32>
    %249 = arith.addf %246, %248 : vector<16x32xf32>
    %250 = vector.shape_cast %249 : vector<16x32xf32> to vector<2x8x32xf32>
    %251 = arith.truncf %250 : vector<2x8x32xf32> to vector<2x8x32xbf16>
    %c0_79 = arith.constant 0 : index
    %c0_80 = arith.constant 0 : index
    %c0_81 = arith.constant 0 : index
    %252 = vector.load %arg11[%c0_79, %c0_80, %c0_81] : memref<2x8x32xbf16, #tpu.memory_space<vmem>>, vector<2x8x32xbf16>
    tpu.vector_store %arg11[%c0_79, %c0_80, %c0_81], %251 {strides = array<i32>} : memref<2x8x32xbf16, #tpu.memory_space<vmem>>, vector<2x8x32xbf16>,
    return
  }
  func.func @transform_0(%arg0: i32) -> (i32, i32, i32) {
    %c0_i32 = arith.constant 0 : i32
    %c0_i32_0 = arith.constant 0 : i32
    %c0_i32_1 = arith.constant 0 : i32
    return %arg0, %c0_i32, %c0_i32_0 : i32, i32, i32
  }
  func.func @transform_1(%arg0: i32) -> (i32, i32, i32) {
    %c0_i32 = arith.constant 0 : i32
    %c0_i32_0 = arith.constant 0 : i32
    %c0_i32_1 = arith.constant 0 : i32
    %c0_i32_2 = arith.constant 0 : i32
    return %c0_i32, %c0_i32_0, %c0_i32_1 : i32, i32, i32
  }
  func.func @transform_2(%arg0: i32) -> (i32, i32) {
    %c0_i32 = arith.constant 0 : i32
    %c0_i32_0 = arith.constant 0 : i32
    %c0_i32_1 = arith.constant 0 : i32
    return %c0_i32, %c0_i32_0 : i32, i32
  }
  func.func @transform_3(%arg0: i32) -> (i32, i32) {
    %c0_i32 = arith.constant 0 : i32
    %c0_i32_0 = arith.constant 0 : i32
    %c0_i32_1 = arith.constant 0 : i32
    return %c0_i32, %c0_i32_0 : i32, i32
  }
  func.func @transform_4(%arg0: i32) -> (i32, i32) {
    %c0_i32 = arith.constant 0 : i32
    %c0_i32_0 = arith.constant 0 : i32
    %c0_i32_1 = arith.constant 0 : i32
    return %c0_i32, %c0_i32_0 : i32, i32
  }
  func.func @transform_5(%arg0: i32) -> (i32, i32) {
    %c0_i32 = arith.constant 0 : i32
    %c0_i32_0 = arith.constant 0 : i32
    %c0_i32_1 = arith.constant 0 : i32
    return %c0_i32, %c0_i32_0 : i32, i32
  }
  func.func @transform_6(%arg0: i32) -> (i32, i32) {
    %c0_i32 = arith.constant 0 : i32
    %c0_i32_0 = arith.constant 0 : i32
    %c0_i32_1 = arith.constant 0 : i32
    return %c0_i32, %c0_i32_0 : i32, i32
  }
  func.func @transform_7(%arg0: i32) -> (i32, i32) {
    %c0_i32 = arith.constant 0 : i32
    %c0_i32_0 = arith.constant 0 : i32
    %c0_i32_1 = arith.constant 0 : i32
    return %c0_i32, %c0_i32_0 : i32, i32
  }
  func.func @transform_8(%arg0: i32) -> (i32, i32) {
    %c0_i32 = arith.constant 0 : i32
    %c0_i32_0 = arith.constant 0 : i32
    %c0_i32_1 = arith.constant 0 : i32
    return %c0_i32, %c0_i32_0 : i32, i32
  }
  func.func @transform_9(%arg0: i32) -> (i32, i32) {
    %c0_i32 = arith.constant 0 : i32
    %c0_i32_0 = arith.constant 0 : i32
    %c0_i32_1 = arith.constant 0 : i32
    return %c0_i32, %c0_i32_0 : i32, i32
  }
  func.func @transform_10(%arg0: i32) -> (i32, i32, i32) {
    %c0_i32 = arith.constant 0 : i32
    %c0_i32_0 = arith.constant 0 : i32
    %c0_i32_1 = arith.constant 0 : i32
    return %arg0, %c0_i32, %c0_i32_0 : i32, i32, i32
  }
}

</mosaic_0001>

<bundles_post_ra>
// kernel: tpu_custom_call.1
= control target key start
LH: loop header
LB: loop body
LE: loop exit
PB: predicated region body
PF: predicated region fallthrough
CT: control target
= control target key end

     0   :  { %15 = vsyncpa [#allocation3], 0  ;;  %s1698_s0 = inlined_call_operand.hbm [shape: bf16[2,8,32], index: 0, kind: input, shape index: {}]   ;;  %s1699_s1 = inlined_call_operand.hbm [shape: bf16[1,8,32], index: 1, kind: input, shape index: {}]   ;;  %s1700_s2 = inlined_call_operand.hbm [shape: bf16[32,96], index: 2, kind: input, shape index: {}]   ;;  %s1701_s3 = inlined_call_operand.hbm [shape: f32[1,96], index: 3, kind: input, shape index: {}]   ;;  %s1702_s4 = inlined_call_operand.hbm [shape: bf16[3,96], index: 4, kind: input, shape index: {}]   ;;  %s1703_s5 = inlined_call_operand.hbm [shape: f32[1,96], index: 5, kind: input, shape index: {}]   ;;  %s1704_s6 = inlined_call_operand.hbm [shape: bf16[32,32], index: 6, kind: input, shape index: {}]   ;;  %s1705_s7 = inlined_call_operand.hbm [shape: f32[1,32], index: 7, kind: input, shape index: {}]   ;;  %s1706_s8 = inlined_call_operand.hbm [shape: f32[8,32], index: 8, kind: input, shape index: {}]   ;;  %s1707_s9 = inlined_call_operand.vmem [shape: f32[8,32], index: 9, kind: input, shape index: {}]   ;;  %s1708_s10 = inlined_call_operand.hbm [shape: bf16[2,8,32], index: 10, kind: output, shape index: {}]  }
   0x1   :  { %16 = vsyncpa [#allocation6], 0 }
   0x2   :  { %17 = vsyncpa [#allocation9], 0 }
   0x3   :  { %18 = vsyncpa [#allocation12], 0 }
   0x4   :  { %19 = vsyncpa [#allocation15], 0  ;;  %s39_s15 = sshll.u32 %s1699_s1, 4  ;;  %s40_s15 = int_to_ptr.hbm [resolvable:$true] %s39_s15 }
   0x5   :  { %20 = vsyncpa [#allocation4], 0  ;;  %s1339_s16 = smov [#allocation5]   ;;  %s63_s20 = sshll.u32 %s1701_s3, 4  ;;  %s64_s20 = int_to_ptr.hbm [resolvable:$true] %s63_s20 }
   0x6   :  { %s41_s17 = sshll.u32 %s1339_s16, 4  ;;  %s1340_s21 = smov [#allocation8]   ;;  %s42_s17 = int_to_ptr.vmem [resolvable:$true] %s41_s17 }
   0x7   :  { %44 = dma.hbm_to_vmem [thread:$0]  %s40_s15, 64, %s42_s17, [#allocation6]  }
   0x8   :  { %s65_s22 = sshll.u32 %s1340_s21, 4  ;;  %s85_s25 = sshll.u32 %s1703_s5, 4  ;;  %s66_s22 = int_to_ptr.vmem [resolvable:$true] %s65_s22  ;;  %s86_s25 = int_to_ptr.hbm [resolvable:$true] %s85_s25 }
   0x9   :  { %68 = dma.hbm_to_vmem [thread:$0]  %s64_s20, 16, %s66_s22, [#allocation9]  }
   0xa   :  { %s109_s27 = sshll.u32 %s1705_s7, 4  ;;  %s1341_s28 = smov [#allocation11]   ;;  %s110_s27 = int_to_ptr.hbm [resolvable:$true] %s109_s27 }
   0xb   :  { %s87_s29 = sshll.u32 %s1341_s28, 4  ;;  %s1342_s3 = smov [#allocation14]   ;;  %s88_s29 = int_to_ptr.vmem [resolvable:$true] %s87_s29 }
   0xc   :  { %90 = dma.hbm_to_vmem [thread:$0]  %s86_s25, 16, %s88_s29, [#allocation12]  }
   0xd   :  { %s111_s30 = sshll.u32 %s1342_s3, 4  ;;  %s25_s13 = sshll.u32 %s1698_s0, 4  ;;  %s112_s30 = int_to_ptr.vmem [resolvable:$true] %s111_s30  ;;  %s26_s13 = int_to_ptr.hbm [resolvable:$true] %s25_s13 }
   0xe   :  { %114 = dma.hbm_to_vmem [thread:$0]  %s110_s27, 16, %s112_s30, [#allocation15]  }
   0xf   :  { %s1343_s5 = smov [#allocation2]   ;;  %s49_s7 = sshll.u32 %s1700_s2, 4  ;;  %s50_s7 = int_to_ptr.hbm [resolvable:$true] %s49_s7 }
  0x10   :  { %s27_s14 = sshll.u32 %s1343_s5, 4  ;;  %s1344_s17 = smov 64   ;;  %s28_s14 = int_to_ptr.vmem [resolvable:$true] %s27_s14 }
  0x11   :  { %s1345_s18 = smov 4   ;;  %s1346_s19 = smov [#allocation7]  }
  0x12   :  { %33 = dma.hbm_to_vmem [thread:$0]  %s26_s13, 128, %s28_s14, [#allocation3], %s1344_s17, %s1344_s17, %s1345_s18  }
  0x13   :  { %s51_s20 = sshll.u32 %s1346_s19, 4  ;;  %s74_s22 = sshll.u32 %s1702_s4, 4  ;;  %s52_s20 = int_to_ptr.vmem [resolvable:$true] %s51_s20  ;;  %s75_s22 = int_to_ptr.hbm [resolvable:$true] %s74_s22 }
  0x14   :  { %57 = dma.hbm_to_vmem [thread:$0]  %s50_s7, 256, %s52_s20, [#allocation6], %s1344_s17, %s1344_s17, %s1345_s18  }
  0x15   :  { %s95_s24 = sshll.u32 %s1704_s6, 4  ;;  %s1347_s25 = smov [#allocation10]   ;;  %s96_s24 = int_to_ptr.hbm [resolvable:$true] %s95_s24 }
  0x16   :  { %s76_s1 = sshll.u32 %s1347_s25, 4  ;;  %s1348_s26 = smov [#allocation13]   ;;  %s77_s1 = int_to_ptr.vmem [resolvable:$true] %s76_s1 }
  0x17   :  { %79 = dma.hbm_to_vmem [thread:$0]  %s75_s22, 32, %s77_s1, [#allocation9]  }
  0x18   :  { %s97_s27 = sshll.u32 %s1348_s26, 4  ;;  %s120_s4 = sshll.u32 %s1706_s8, 4  ;;  %s98_s27 = int_to_ptr.vmem [resolvable:$true] %s97_s27  ;;  %s121_s4 = int_to_ptr.hbm [resolvable:$true] %s120_s4 }
  0x19   :  { %103 = dma.hbm_to_vmem [thread:$0]  %s96_s24, 256, %s98_s27, [#allocation12], %s1344_s17, %s1344_s17, %s1345_s18  }
  0x1a   :  { %s1349_s3 = smov [#allocation16]  }
  0x1b   :  { %s122_s30 = sshll.u32 %s1349_s3, 4  ;;  %s123_s30 = int_to_ptr.vmem [resolvable:$true] %s122_s30 }
  0x1c   :  { %125 = dma.hbm_to_vmem [thread:$0]  %s121_s4, 128, %s123_s30, [#allocation15]  }
  0x1d   :  { %1327 = dma.done.wait [#allocation3], 128  }
  0x1e   :  { %1328 = vsyncadd [#allocation3], 4294967168 }
  0x1f   :  { %1329 = dma.done.wait [#allocation6], 320  }
  0x20   :  { %1330 = vsyncadd [#allocation6], 4294966976 }
  0x21   :  { %1331 = dma.done.wait [#allocation9], 48  }
  0x22   :  { %1332 = vsyncadd [#allocation9], 4294967248 }
  0x23   :  { %1333 = dma.done.wait [#allocation12], 272  }
  0x24   :  { %1334 = vsyncadd [#allocation12], 4294967024 }
  0x25   :  { %1335 = dma.done.wait [#allocation15], 144  }
  0x26   :  { %1336 = vsyncadd [#allocation15], 4294967152  ;;  %v1002_v0 = vld [vmem:[#allocation7 + $0x8] sm:$0xff]  ;;  %v1006_v1 = vld [vmem:[#allocation2] sm:$0xff]   ;;  %vm200_vm0 = vcmask 261120   ;;  %v218_v14 = vlaneseq  ;;  %s1350_s6 = smov 96  }
  0x27   :  { %v1007_v2 = vunpack.c.l.bf16 %v1006_v1  ;;  %v1008_v3 = vunpack.c.h.bf16 %v1006_v1  ;;  %v167_v4 = vld [vmem:[#allocation5] sm:$0xf]  ;;  %210 = vmatpush.bf16.msra.mxu0 %v1002_v0  ;;  %v1001_v5 = vld [vmem:[#allocation7] sm:$0xff]  ;;  %v1052_v18 = vld [vmem:[#allocation8] ss:$0 sm:$0xff]  ;;  %s1351_s8 = smov 32  }
  0x28   :  { %v170_v6 = vunpack.c.l.bf16 %v167_v4  ;;  %v1460_v15 = vshrl.u32 %v218_v14, 7  ;;  %v263_v20 = vld [vmem:[#allocation10] sm:$0x3]  ;;  %v1053_v53 = vld [vmem:[#allocation11] ss:$0 sm:$0xff]  ;;  %vm301_vm7 = vcmask 1047808  }
  0x29   :  { %v264_v23 = vunpack.c.l.bf16 %v263_v20  ;;  %v1504_v62 = vld [vmem:[#allocation16] sm:$0xff]  ;;  %s1352_s11 = smov 100   ;;  %s1353_s12 = smov 124   ;;  %vm402_vm9 = vcmask 64512   ;;  %vm443_vm11 = vcmask 1043456   ;;  %vm647_vm12 = vcmask 130048  }
  0x2a   :  { %v171_v7 = vadd.f32 %v1007_v2, %v170_v6  ;;  %v172_v8 = vadd.f32 %v1008_v3, %v170_v6  ;;  %v220_v17 = vadd.s32 8, %v1460_v15  ;;  %v225_v19 = vand.u32 7, %v1460_v15  ;;  %s1355_s14 = smov 88   ;;  %s1356_s15 = smov 120  }
  0x2b   :  { %211 = vmatpush.bf16.msra.mxu0 %v1001_v5  ;;  %vm249_vm3 = vcmp.lt.s32.totalorder %v1460_v15, 1  ;;  %vm258_vm4 = vcmp.lt.s32.totalorder %v1460_v15, 2  ;;  %v265_v30 = vperm.slane %v264_v23, 0  ;;  %v268_v31 = vperm.slane %v264_v23, 1  ;;  %s1357_s16 = smov 104   ;;  %s1358_s7 = smov 80  }
  0x2c   :  { %v173_v9 = vpack.c.bf16 %v171_v7, %v171_v7  ;;  %v174_v10 = vpack.c.bf16 %v172_v8, %v172_v8  ;;  %v232_v21 = vand.u32 7, %v220_v17  ;;  %vm1464_vm1 = vcmp.ge.s32.totalorder %v225_v19, 1  ;;  %s1359_s19 = smov 112   ;;  %s1360_s20 = smov 56  }
  0x2d   :  { %vm1474_vm5 = vcmp.ge.s32.totalorder %v225_v19, 2  ;;  %v273_v36 = vperm.slane %v264_v23, 2  ;;  %v1522_v7 = vand.u32 127, %v218_v14  ;;  %s1361_s0 = smov 48   ;;  %s1362_s21 = smov 40   ;;  %vm649_vm13 = vcmask 195584  }
  0x2e   :  { %v185_v11 = vunpack.c.l.b16 %v173_v9  ;;  %v186_v12 = vunpack.c.l.b16 %v174_v10  ;;  %vm1468_vm2 = vcmp.ge.s32.totalorder %v232_v21, 1  ;;  %vm1478_vm6 = vcmp.ge.s32.totalorder %v232_v21, 2  ;;  %v1532_v10 = vld [vmem:[%s1707_s9] sm:$0xff]  ;;  %s1354_s9 = smov 72   ;;  %s1363_s22 = smov 8  }
  0x2f   :  { %v292_v8 = vand.u32 7, %v1522_v7  ;;  %vm1595_vm10 = vcmp.le.s32.totalorder %v1522_v7, %v1460_v15  ;;  %s1364_s2 = smov 16   ;;  %s1365_s23 = smov 24   ;;  %vm941_vm14 = vcmask 257024  }
  0x30   :  { %v187_v13 = vpack.c.b16 %v186_v12, %v185_v11  ;;  %s1366_s24 = smov [#allocation17]   ;;  %s950_s27 = sshll.u32 %s1708_s10, 4  ;;  %s951_s27 = int_to_ptr.hbm [resolvable:$true] %s950_s27 }
  0x31   :  { %vm1525_vm8 = vcmp.lt.s32.totalorder %v292_v8, 4  ;;  %s948_s25 = sshll.u32 %s1366_s24, 4  ;;  %s949_s25 = int_to_ptr.vmem [resolvable:$true] %s948_s25 }
  0x32   :  { %975 = vmatmul.msk.bf16.vlgmr.msra.gmra.mxu0 %vm200_vm0, %v187_v13 }
  0xaf   :  { %v213_v16 = vpop.f32.mrf.mxu0 }
  0xb0   :  { %v214_v22 = vadd.f32 %v1052_v18, %v213_v16 }
  0xb2   :  { %v247_v32 = vrot.slane %v214_v22, 7  ;;  %v256_v33 = vrot.slane %v214_v22, 6  ;;  %v274_v49 = vmul.f32 %v273_v36, %v214_v22 }
  0xb7   :  { %v215_v24 = vpop.f32.mrf.mxu0 }
  0xb8   :  { %v216_v26 = vadd.f32 %v1052_v18, %v215_v24 }
  0xba   :  { %v248_v34 = vrot.slane %v216_v26, 7  ;;  %v257_v35 = vrot.slane %v216_v26, 6  ;;  %v275_v52 = vmul.f32 %v273_v36, %v216_v26 }
  0xbc   :  { %v250_v37 = vsel %vm249_vm3, %v247_v32, %v248_v34  ;;  %v251_v38 = vsel %vm249_vm3, %v248_v34, %v247_v32  ;;  %v259_v39 = vsel %vm258_vm4, %v256_v33, %v257_v35  ;;  %v260_v40 = vsel %vm258_vm4, %v257_v35, %v256_v33 }
  0xbd   :  { %v252_v41 = vsel %vm1464_vm1, %v251_v38, 0.0  ;;  %v253_v42 = vsel %vm1468_vm2, %v250_v37, 0.0  ;;  %v261_v43 = vsel %vm1474_vm5, %v260_v40, 0.0  ;;  %v262_v44 = vsel %vm1478_vm6, %v259_v39, 0.0 }
  0xbe   :  { %v266_v45 = vmul.f32 %v265_v30, %v261_v43  ;;  %v267_v46 = vmul.f32 %v265_v30, %v262_v44  ;;  %v269_v47 = vmul.f32 %v268_v31, %v252_v41  ;;  %v270_v48 = vmul.f32 %v268_v31, %v253_v42 }
  0xc0   :  { %v271_v50 = vadd.f32 %v269_v47, %v266_v45  ;;  %v272_v51 = vadd.f32 %v270_v48, %v267_v46 }
  0xc2   :  { %v276_v54 = vadd.f32 %v274_v49, %v271_v50  ;;  %v277_v55 = vadd.f32 %v275_v52, %v272_v51 }
  0xc4   :  { %v1490_v56 = vadd.f32 %v1053_v53, %v276_v54  ;;  %v1492_v57 = vadd.f32 %v1053_v53, %v277_v55 }
  0xc6   :  { %340 = vrot.lane.b32.xlu0 %v1490_v56, %s1350_s6  ;;  %342 = vrot.lane.b32.xlu1 %v1492_v57, %s1350_s6  ;;  %v330_v36 = vmul.f32 %v1504_v62, %v1490_v56 }
 0x138   :  { %v341_v58 = vpop.permute.xlu0 %340  ;;  %v343_v59 = vpop.permute.xlu1 %342 }
 0x139   :  { %346 = vrot.lane.b32.xlu0 %v341_v58, %s1351_s8  ;;  %349 = vrot.lane.b32.xlu2 %v343_v59, %s1351_s8 }
 0x141   :  { %302 = vrot.lane.b32.xlu2 %v1490_v56, %s1351_s8 }
 0x193   :  { %v350_v60 = vpop.permute.xlu2 %349 }
 0x194   :  { %v351_v61 = vsel %vm301_vm7, %v350_v60, %v343_v59 }
 0x195   :  { %354 = vrot.lane.b32.xlu2 %v351_v61, %s1351_s8 }
 0x19b   :  { %v303_v3 = vpop.permute.xlu2 %302 }
 0x19c   :  { %v304_v4 = vsel %vm301_vm7, %v303_v3, %v1490_v56 }
 0x19d   :  { %375 = vrot.lane.b32.xlu2 %v1504_v62, %s1351_s8 }
 0x1ab   :  { %v347_v63 = vpop.permute.xlu0 %346 }
 0x1ac   :  { %v348_v0 = vsel %vm301_vm7, %v347_v63, %v341_v58 }
 0x1ad   :  { %352 = vrot.lane.b32.xlu1 %v348_v0, %s1351_s8 }
 0x1ef   :  { %v355_v5 = vpop.permute.xlu2 %354 }
 0x1f0   :  { %v357_v6 = vsel %vm301_vm7, %v355_v5, %v343_v59  ;;  %v394_v5 = vpack.c.bf16 %v1490_v56, %v1490_v56 }
 0x1f7   :  { %v376_v24 = vpop.permute.xlu2 %375 }
 0x1f8   :  { %v378_v25 = vmul.f32 %v376_v24, %v1490_v56  ;;  %v379_v41 = vmul.f32 %v376_v24, %v1492_v57 }
 0x21f   :  { %v353_v1 = vpop.permute.xlu1 %352 }
 0x220   :  { %v356_v2 = vsel %vm301_vm7, %v353_v1, %v341_v58  ;;  %v331_v58 = vmul.f32 %v1504_v62, %v1492_v57  ;;  %v436_v62 = vunpack.c.l.b16 %v394_v5 }
 0x221   :  { %366 = vrot.lane.b32.xlu1 %v356_v2, %s1352_s11  ;;  %360 = vrot.lane.b32.xlu0 %v356_v2, %s1353_s12 }
 0x229   :  { %308 = vrot.lane.b32.xlu1 %v304_v4, %s1351_s8  ;;  %305 = vrot.lane.b32.xlu0 %v1492_v57, %s1351_s8 }
 0x231   :  { %368 = vrot.lane.b32.xlu1 %v357_v6, %s1352_s11  ;;  %362 = vrot.lane.b32.xlu0 %v357_v6, %s1353_s12 }
 0x293   :  { %v367_v11 = vpop.permute.xlu1 %366  ;;  %v361_v12 = vpop.permute.xlu0 %360 }
 0x294   :  { %v372_v13 = vsel %vm1525_vm8, %v361_v12, %v367_v11 }
 0x295   :  { %v380_v16 = vmul.f32 %v372_v13, %v1532_v10 }
 0x297   :  { %384 = vrot.lane.b32.xlu2 %v380_v16, %s1351_s8 }
 0x29b   :  { %v309_v14 = vpop.permute.xlu1 %308  ;;  %v306_v17 = vpop.permute.xlu0 %305 }
 0x29c   :  { %v312_v18 = vsel %vm301_vm7, %v309_v14, %v1490_v56  ;;  %v307_v19 = vsel %vm301_vm7, %v306_v17, %v1492_v57 }
 0x29d   :  { %316 = vrot.lane.b32.xlu1 %v312_v18, %s1353_s12  ;;  %310 = vrot.lane.b32.xlu0 %v307_v19, %s1351_s8 }
 0x29f   :  { %322 = vrot.lane.b32.xlu2 %v312_v18, %s1352_s11 }
 0x2a3   :  { %v369_v20 = vpop.permute.xlu1 %368  ;;  %v363_v21 = vpop.permute.xlu0 %362 }
 0x2a4   :  { %v373_v22 = vsel %vm1525_vm8, %v363_v21, %v369_v20 }
 0x2a5   :  { %v381_v23 = vmul.f32 %v373_v22, %v1532_v10 }
 0x2a7   :  { %386 = vrot.lane.b32.xlu0 %v381_v23, %s1351_s8 }
 0x2f1   :  { %v385_v26 = vpop.permute.xlu2 %384 }
 0x2f2   :  { %v390_v27 = vadd.f32 %v385_v26, %v378_v25 }
 0x2f4   :  { %v392_v28 = vpack.c.bf16 %v390_v27, %v390_v27 }
 0x2f6   :  { %v398_v29 = vunpack.c.l.b16 %v392_v28 }
 0x2f8   :  { %v399_v30 = vpack.c.b16 %v398_v29, %v398_v29 }
 0x2f9   :  { %v323_v31 = vpop.permute.xlu2 %322 }
 0x2fa   :  { %400 = vrot.lane.b32.xlu0 %v399_v30, %s1350_s6 }
 0x302   :  { %579 = vrot.lane.b32.xlu0 %v399_v30, %s1354_s9 }
 0x30f   :  { %v317_v32 = vpop.permute.xlu1 %316  ;;  %v311_v33 = vpop.permute.xlu0 %310 }
 0x310   :  { %v328_v34 = vsel %vm1525_vm8, %v317_v32, %v323_v31  ;;  %v313_v35 = vsel %vm301_vm7, %v311_v33, %v1492_v57 }
 0x311   :  { %v332_v37 = vmul.f32 %v328_v34, %v1532_v10  ;;  %324 = vrot.lane.b32.xlu2 %v313_v35, %s1352_s11  ;;  %318 = vrot.lane.b32.xlu1 %v313_v35, %s1353_s12 }
 0x313   :  { %v334_v38 = vadd.f32 %v332_v37, %v330_v36 }
 0x315   :  { %v336_v39 = vpack.c.bf16 %v334_v38, %v334_v38 }
 0x317   :  { %v461_v40 = vunpack.c.l.b16 %v336_v39 }
 0x319   :  { %465 = vrot.lane.b32.xlu1 %v399_v30, %s1355_s14  ;;  %v387_v42 = vpop.permute.xlu0 %386  ;;  %v462_v43 = vpack.c.b16 %v461_v40, %v461_v40 }
 0x31a   :  { %v391_v44 = vadd.f32 %v387_v42, %v379_v41 }
 0x31b   :  { %463 = vrot.lane.b32.xlu2 %v462_v43, %s1356_s15 }
 0x31c   :  { %v393_v45 = vpack.c.bf16 %v391_v44, %v391_v44 }
 0x31e   :  { %v652_v46 = vunpack.c.l.b16 %v393_v45 }
 0x320   :  { %v653_v47 = vpack.c.b16 %v652_v46, %v652_v46 }
 0x321   :  { %577 = vrot.lane.b32.xlu1 %v462_v43, %s1357_s16 }
 0x322   :  { %717 = vrot.lane.b32.xlu0 %v653_v47, %s1355_s14 }
 0x323   :  { %522 = vrot.lane.b32.xlu2 %v399_v30, %s1358_s7 }
 0x329   :  { %520 = vrot.lane.b32.xlu1 %v462_v43, %s1359_s19 }
 0x32a   :  { %654 = vrot.lane.b32.xlu0 %v653_v47, %s1350_s6 }
 0x331   :  { %831 = vrot.lane.b32.xlu1 %v653_v47, %s1354_s9 }
 0x332   :  { %774 = vrot.lane.b32.xlu0 %v653_v47, %s1358_s7 }
 0x36b   :  { %v325_v49 = vpop.permute.xlu2 %324 }
 0x36c   :  { %v401_v48 = vpop.permute.xlu0 %400 }
 0x36d   :  { %v407_v50 = vsel %vm402_vm9, %v401_v48, 0 }
 0x36e   :  { %416 = vmatpush.bf16.xpose.msra.mxu1 %v407_v50 }
 0x374   :  { %v580_v63 = vpop.permute.xlu0 %579 }
 0x375   :  { %v464_v51 = vpop.permute.xlu2 %463  ;;  %976 = vmatmul.msk.bf16.vlgmr.msra.gmra.mxu1 %vm402_vm9, %v336_v39  ;;  %v585_v3 = vsel %vm402_vm9, %v580_v63, 0 }
 0x37d   :  { %v523_v52 = vpop.permute.xlu2 %522 }
 0x37e   :  { %v528_v53 = vsel %vm402_vm9, %v523_v52, 0 }
 0x37f   :  { %537 = vmatpush.bf16.xpose.msrb.mxu0 %v528_v53 }
 0x383   :  { %v319_v54 = vpop.permute.xlu1 %318 }
 0x384   :  { %v329_v55 = vsel %vm1525_vm8, %v319_v54, %v325_v49 }
 0x385   :  { %v333_v59 = vmul.f32 %v329_v55, %v1532_v10  ;;  %v1581_v10 = vpack.c.b16 %v436_v62, %v436_v62 }
 0x387   :  { %v335_v60 = vadd.f32 %v333_v59, %v331_v58 }
 0x389   :  { %v337_v61 = vpack.c.bf16 %v335_v60, %v335_v60 }
 0x38b   :  { %v466_v0 = vpop.permute.xlu1 %465  ;;  %v713_v1 = vunpack.c.l.b16 %v337_v61 }
 0x38c   :  { %v471_v2 = vsel %vm402_vm9, %v466_v0, 0 }
 0x38d   :  { %480 = vmatpush.bf16.xpose.msra.mxu3 %v471_v2  ;;  %v714_v4 = vpack.c.b16 %v713_v1, %v713_v1 }
 0x38f   :  { %772 = vrot.lane.b32.xlu1 %v714_v4, %s1359_s19  ;;  %715 = vrot.lane.b32.xlu2 %v714_v4, %s1356_s15 }
 0x393   :  { %v578_v6 = vpop.permute.xlu1 %577 }
 0x394   :  { %978 = vmatmul.msk.bf16.vlgmr.msra.gmra.mxu3 %vm402_vm9, %v464_v51  ;;  %v718_v8 = vpop.permute.xlu0 %717 }
 0x395   :  { %594 = vmatpush.bf16.xpose.msrb.mxu3 %v585_v3  ;;  %v723_v9 = vsel %vm402_vm9, %v718_v8, 0 }
 0x397   :  { %499 = vrot.lane.b32.xlu1 %v1581_v10, %s1360_s20  ;;  %829 = vrot.lane.b32.xlu2 %v714_v4, %s1357_s16 }
 0x39b   :  { %v521_v56 = vpop.permute.xlu1 %520 }
 0x39c   :  { %980 = vmatmul.msk.bf16.vlgmr.msrb.gmra.mxu0 %vm402_vm9, %v521_v56  ;;  %v655_v11 = vpop.permute.xlu0 %654  ;;  %v395_v56 = vpack.c.bf16 %v1492_v57, %v1492_v57 }
 0x39d   :  { %732 = vmatpush.bf16.xpose.msra.mxu3 %v723_v9  ;;  %v660_v12 = vsel %vm402_vm9, %v655_v11, 0 }
 0x39e   :  { %669 = vmatpush.bf16.xpose.msra.mxu0 %v660_v12  ;;  %v689_v12 = vunpack.c.l.b16 %v395_v56 }
 0x3a3   :  { %v832_v13 = vpop.permute.xlu1 %831 }
 0x3a4   :  { %v837_v16 = vsel %vm402_vm9, %v832_v13, 0  ;;  %982 = vmatmul.msk.bf16.vlgmr.msrb.gmra.mxu3 %vm402_vm9, %v578_v6  ;;  %v775_v14 = vpop.permute.xlu0 %774  ;;  %v690_v13 = vpack.c.b16 %v689_v12, %v689_v12 }
 0x3a5   :  { %v780_v17 = vsel %vm402_vm9, %v775_v14, 0  ;;  %846 = vmatpush.bf16.xpose.msrb.mxu3 %v837_v16 }
 0x3a6   :  { %789 = vmatpush.bf16.xpose.msrb.mxu0 %v780_v17 }
 0x3ac   :  { %984 = vmatmul.msk.bf16.vlgmr.msra.gmra.mxu0 %vm402_vm9, %v337_v61 }
 0x3e9   :  { %v716_v18 = vpop.permute.xlu2 %715 }
 0x3ea   :  { %986 = vmatmul.msk.bf16.vlgmr.msra.gmra.mxu3 %vm402_vm9, %v716_v18 }
 0x3f1   :  { %v830_v23 = vpop.permute.xlu2 %829 }
 0x3f2   :  { %v418_v20 = vpop.f32.mrf.mxu1 }
 0x3f3   :  { %v422_v21 = vsel %vm1595_vm10, %v418_v20, -inf }
 0x3f4   :  { %v423_v22 = vsel %vm402_vm9, %v422_v21, -inf }
 0x3f5   :  { %424 = vmax.xlane.f32.xlu2 %v423_v22 }
 0x3fa   :  { %v420_v24 = vpop.f32.mrf.mxu1  ;;  %990 = vmatmul.msk.bf16.vlgmr.msrb.gmra.mxu3 %vm402_vm9, %v830_v23 }
 0x401   :  { %v773_v25 = vpop.permute.xlu1 %772 }
 0x402   :  { %988 = vmatmul.msk.bf16.vlgmr.msrb.gmra.mxu0 %vm402_vm9, %v773_v25 }
 0x409   :  { %v500_v2 = vpop.permute.xlu1 %499 }
 0x40a   :  { %v505_v62 = vsel %vm443_vm11, %v500_v2, 0 }
 0x417   :  { %v482_v26 = vpop.f32.mrf.mxu3 }
 0x418   :  { %v486_v15 = vsel %vm1595_vm10, %v482_v26, -inf }
 0x419   :  { %v539_v7 = vpop.f32.mrf.mxu0  ;;  %v487_v27 = vsel %vm402_vm9, %v486_v15, -inf }
 0x41a   :  { %v543_v28 = vsel %vm1595_vm10, %v539_v7, -inf  ;;  %488 = vmax.xlane.f32.xlu0 %v487_v27 }
 0x41b   :  { %v544_v29 = vsel %vm402_vm9, %v543_v28, -inf }
 0x41c   :  { %545 = vmax.xlane.f32.xlu2 %v544_v29 }
 0x41f   :  { %v484_v30 = vpop.f32.mrf.mxu3 }
 0x421   :  { %v541_v31 = vpop.f32.mrf.mxu0 }
 0x427   :  { %v596_v32 = vpop.f32.mrf.mxu3 }
 0x428   :  { %v1618_v37 = vsel %vm1595_vm10, %v596_v32, -inf }
 0x429   :  { %v671_v33 = vpop.f32.mrf.mxu0  ;;  %v601_v39 = vsel %vm402_vm9, %v1618_v37, -inf }
 0x42a   :  { %v1612_v34 = vsel %vm1595_vm10, %v671_v33, -inf }
 0x42b   :  { %v676_v35 = vsel %vm402_vm9, %v1612_v34, -inf }
 0x42c   :  { %677 = vmax.xlane.f32.xlu1 %v676_v35 }
 0x42f   :  { %v598_v36 = vpop.f32.mrf.mxu3 }
 0x431   :  { %v673_v38 = vpop.f32.mrf.mxu0 }
 0x434   :  { %438 = vrot.lane.b32.xlu2 %v1581_v10, %s1344_s17  ;;  %602 = vmax.xlane.f32.xlu1 %v601_v39 }
 0x44d   :  { %556 = vrot.lane.b32.xlu1 %v1581_v10, %s1361_s0 }
 0x468   :  { %v425_v44 = vpop.xlane.xlu2 %424 }
 0x469   :  { %v426_v47 = vsub.f32 %v422_v21, %v425_v44 }
 0x46b   :  { %v427_v50 = vmul.f32 1.442695, %v426_v47 }
 0x46d   :  { %v734_v40 = vpop.f32.mrf.mxu3  ;;  %1055 = vpow2.f32 %v427_v50 }
 0x46e   :  { %v1628_v41 = vsel %vm1595_vm10, %v734_v40, -inf }
 0x46f   :  { %v739_v42 = vsel %vm402_vm9, %v1628_v41, -inf }
 0x470   :  { %740 = vmax.xlane.f32.xlu2 %v739_v42 }
 0x473   :  { %v1644_v58 = vpop.eup %1055 }
 0x474   :  { %v429_v0 = vsel %vm402_vm9, %v1644_v58, 0.0 }
 0x475   :  { %v736_v43 = vpop.f32.mrf.mxu3 }
 0x47d   :  { %v848_v45 = vpop.f32.mrf.mxu3 }
 0x47e   :  { %v1640_v52 = vsel %vm1595_vm10, %v848_v45, -inf }
 0x47f   :  { %v791_v46 = vpop.f32.mrf.mxu0  ;;  %v853_v54 = vsel %vm402_vm9, %v1640_v52, -inf }
 0x480   :  { %v1634_v48 = vsel %vm1595_vm10, %v791_v46, -inf }
 0x481   :  { %v796_v49 = vsel %vm402_vm9, %v1634_v48, -inf }
 0x482   :  { %797 = vmax.xlane.f32.xlu0 %v796_v49 }
 0x485   :  { %v850_v51 = vpop.f32.mrf.mxu3 }
 0x487   :  { %v793_v53 = vpop.f32.mrf.mxu0 }
 0x48a   :  { %854 = vmax.xlane.f32.xlu0 %v853_v54 }
 0x48d   :  { %v489_v55 = vpop.xlane.xlu0 %488 }
 0x48e   :  { %v490_v59 = vsub.f32 %v486_v15, %v489_v55 }
 0x48f   :  { %v546_v60 = vpop.xlane.xlu2 %545 }
 0x490   :  { %v491_v61 = vmul.f32 1.442695, %v490_v59  ;;  %v547_v63 = vsub.f32 %v543_v28, %v546_v60 }
 0x492   :  { %1057 = vpow2.f32 %v491_v61  ;;  %v548_v1 = vmul.f32 1.442695, %v547_v63  ;;  %430 = vadd.xlane.f32.xlu0 %v429_v0 }
 0x494   :  { %1059 = vpow2.f32 %v548_v1 }
 0x497   :  { %v439_v3 = vpop.permute.xlu2 %438 }
 0x498   :  { %v1648_v4 = vpop.eup %1057  ;;  %v445_v5 = vsel %vm443_vm11, %v439_v3, 0 }
 0x499   :  { %454 = vmatpush.bf16.msra.mxu2 %v445_v5  ;;  %v493_v6 = vsel %vm402_vm9, %v1648_v4, 0.0 }
 0x49a   :  { %v1060_v8 = vpop.eup %1059  ;;  %494 = vadd.xlane.f32.xlu1 %v493_v6 }
 0x49b   :  { %v550_v9 = vsel %vm402_vm9, %v1060_v8, 0.0 }
 0x49c   :  { %551 = vadd.xlane.f32.xlu2 %v550_v9 }
 0x49d   :  { %514 = vmatpush.bf16.msrb.mxu2 %v505_v62 }
 0x49f   :  { %v678_v11 = vpop.xlane.xlu1 %677 }
 0x4a0   :  { %v679_v14 = vsub.f32 %v1612_v34, %v678_v11 }
 0x4a2   :  { %v680_v19 = vmul.f32 1.442695, %v679_v14 }
 0x4a4   :  { %1061 = vpow2.f32 %v680_v19 }
 0x4a6   :  { %613 = vrot.lane.b32.xlu0 %v1581_v10, %s1362_s21 }
 0x4a7   :  { %v603_v16 = vpop.xlane.xlu1 %602 }
 0x4a8   :  { %v604_v10 = vsub.f32 %v1618_v37, %v603_v16 }
 0x4aa   :  { %v605_v20 = vmul.f32 1.442695, %v604_v10  ;;  %v1062_v57 = vpop.eup %1061 }
 0x4ab   :  { %v682_v21 = vsel %vm402_vm9, %v1062_v57, 0.0 }
 0x4ac   :  { %1063 = vpow2.f32 %v605_v20 }
 0x4b2   :  { %v1064_v22 = vpop.eup %1063 }
 0x4b3   :  { %691 = vrot.lane.b32.xlu1 %v690_v13, %s1344_s17  ;;  %v607_v23 = vsel %vm402_vm9, %v1064_v22, 0.0 }
 0x4b4   :  { %751 = vrot.lane.b32.xlu2 %v690_v13, %s1360_s20 }
 0x4bf   :  { %v557_v17 = vpop.permute.xlu1 %556 }
 0x4c0   :  { %v562_v18 = vsel %vm443_vm11, %v557_v17, 0 }
 0x4c1   :  { %571 = vmatpush.bf16.msrb.mxu1 %v562_v18 }
 0x4d0   :  { %683 = vadd.xlane.f32.xlu0 %v682_v21 }
 0x4d8   :  { %608 = vadd.xlane.f32.xlu0 %v607_v23 }
 0x4e3   :  { %v741_v24 = vpop.xlane.xlu2 %740 }
 0x4e4   :  { %v742_v25 = vsub.f32 %v1628_v41, %v741_v24 }
 0x4e6   :  { %v743_v26 = vmul.f32 1.442695, %v742_v25 }
 0x4e8   :  { %1065 = vpow2.f32 %v743_v26 }
 0x4ee   :  { %v1066_v15 = vpop.eup %1065 }
 0x4ef   :  { %v745_v7 = vsel %vm402_vm9, %v1066_v15, 0.0 }
 0x4f0   :  { %746 = vadd.xlane.f32.xlu1 %v745_v7 }
 0x4f5   :  { %v798_v27 = vpop.xlane.xlu0 %797 }
 0x4f6   :  { %v799_v28 = vsub.f32 %v1634_v48, %v798_v27 }
 0x4f8   :  { %v800_v29 = vmul.f32 1.442695, %v799_v28 }
 0x4fa   :  { %1067 = vpow2.f32 %v800_v29 }
 0x4fd   :  { %v855_v30 = vpop.xlane.xlu0 %854 }
 0x4fe   :  { %v856_v31 = vsub.f32 %v1640_v52, %v855_v30 }
 0x500   :  { %v1068_v32 = vpop.eup %1067  ;;  %v857_v33 = vmul.f32 1.442695, %v856_v31 }
 0x501   :  { %v802_v34 = vsel %vm402_vm9, %v1068_v32, 0.0 }
 0x502   :  { %1069 = vpow2.f32 %v857_v33  ;;  %803 = vadd.xlane.f32.xlu2 %v802_v34  ;;  %v1004_v34 = vld [vmem:[#allocation13 + $0x8] sm:$0xff] }
 0x503   :  { %931 = vmatpush.bf16.msra.mxu0 %v1004_v34 }
 0x505   :  { %v431_v35 = vpop.xlane.xlu0 %430 }
 0x506   :  { %1071 = vrcp.f32 %v431_v35  ;;  %v1003_v35 = vld [vmem:[#allocation13] sm:$0xff] }
 0x507   :  { %932 = vmatpush.bf16.msra.mxu0 %v1003_v35 }
 0x508   :  { %v1070_v36 = vpop.eup %1069 }
 0x509   :  { %808 = vrot.lane.b32.xlu1 %v690_v13, %s1361_s0  ;;  %v859_v37 = vsel %vm402_vm9, %v1070_v36, 0.0 }
 0x50a   :  { %860 = vadd.xlane.f32.xlu0 %v859_v37 }
 0x50c   :  { %v1072_v38 = vpop.eup %1071 }
 0x50d   :  { %v433_v39 = vmul.f32 %v1072_v38, %v1644_v58  ;;  %v495_v40 = vpop.xlane.xlu1 %494 }
 0x50f   :  { %v552_v41 = vpop.xlane.xlu2 %551  ;;  %v434_v42 = vpack.c.bf16 %v433_v39, %v433_v39 }
 0x510   :  { %1073 = vrcp.f32 %v552_v41 }
 0x511   :  { %977 = vmatmul.msk.bf16.vlgmr.msra.gmra.mxu2 %vm402_vm9, %v434_v42  ;;  %1075 = vrcp.f32 %v495_v40 }
 0x516   :  { %v1074_v43 = vpop.eup %1073 }
 0x517   :  { %v554_v44 = vmul.f32 %v1074_v43, %v1060_v8  ;;  %v1076_v45 = vpop.eup %1075  ;;  %v752_v50 = vpop.permute.xlu2 %751 }
 0x518   :  { %v614_v46 = vpop.permute.xlu0 %613  ;;  %v497_v49 = vmul.f32 %v1076_v45, %v1648_v4  ;;  %v757_v52 = vsel %vm443_vm11, %v752_v50, 0 }
 0x519   :  { %v619_v47 = vsel %vm443_vm11, %v614_v46, 0  ;;  %v555_v48 = vpack.c.bf16 %v554_v44, %v554_v44 }
 0x51a   :  { %628 = vmatpush.bf16.msra.mxu2 %v619_v47  ;;  %v498_v51 = vpack.c.bf16 %v497_v49, %v497_v49 }
 0x51b   :  { %981 = vmatmul.msk.bf16.vlgmr.msrb.gmra.mxu1 %vm402_vm9, %v555_v48 }
 0x51e   :  { %865 = vrot.lane.b32.xlu0 %v690_v13, %s1362_s21 }
 0x521   :  { %979 = vmatmul.msk.bf16.vlgmr.msrb.gmra.mxu2 %vm402_vm9, %v498_v51 }
 0x522   :  { %766 = vmatpush.bf16.msrb.mxu2 %v757_v52  ;;  %v1054_v52 = vld [vmem:[#allocation14] ss:$0 sm:$0xff] }
 0x525   :  { %v692_v53 = vpop.permute.xlu1 %691 }
 0x526   :  { %v697_v54 = vsel %vm443_vm11, %v692_v53, 0 }
 0x527   :  { %706 = vmatpush.bf16.msra.mxu1 %v697_v54 }
 0x543   :  { %v684_v55 = vpop.xlane.xlu0 %683 }
 0x544   :  { %1077 = vrcp.f32 %v684_v55 }
 0x54a   :  { %v1078_v58 = vpop.eup %1077 }
 0x54b   :  { %v686_v59 = vmul.f32 %v1078_v58, %v1062_v57  ;;  %v609_v60 = vpop.xlane.xlu0 %608 }
 0x54c   :  { %1079 = vrcp.f32 %v609_v60 }
 0x54d   :  { %v687_v61 = vpack.c.bf16 %v686_v59, %v686_v59 }
 0x54f   :  { %985 = vmatmul.msk.bf16.vlgmr.msra.gmra.mxu1 %vm402_vm9, %v687_v61 }
 0x552   :  { %v1080_v63 = vpop.eup %1079 }
 0x553   :  { %v611_v0 = vmul.f32 %v1080_v63, %v1064_v22 }
 0x555   :  { %v612_v1 = vpack.c.bf16 %v611_v0, %v611_v0 }
 0x557   :  { %983 = vmatmul.msk.bf16.vlgmr.msra.gmra.mxu2 %vm402_vm9, %v612_v1 }
 0x563   :  { %v747_v2 = vpop.xlane.xlu1 %746 }
 0x564   :  { %1081 = vrcp.f32 %v747_v2 }
 0x56a   :  { %v1082_v3 = vpop.eup %1081 }
 0x56b   :  { %v749_v4 = vmul.f32 %v1082_v3, %v1066_v15 }
 0x56d   :  { %v750_v5 = vpack.c.bf16 %v749_v4, %v749_v4 }
 0x56f   :  { %987 = vmatmul.msk.bf16.vlgmr.msrb.gmra.mxu2 %vm402_vm9, %v750_v5 }
 0x575   :  { %v804_v62 = vpop.xlane.xlu2 %803 }
 0x576   :  { %1083 = vrcp.f32 %v804_v62 }
 0x57b   :  { %v809_v6 = vpop.permute.xlu1 %808 }
 0x57c   :  { %v1084_v8 = vpop.eup %1083  ;;  %v814_v9 = vsel %vm443_vm11, %v809_v6, 0 }
 0x57d   :  { %v806_v56 = vmul.f32 %v1084_v8, %v1068_v32  ;;  %823 = vmatpush.bf16.msrb.mxu1 %v814_v9  ;;  %v861_v12 = vpop.xlane.xlu0 %860 }
 0x57e   :  { %1085 = vrcp.f32 %v861_v12 }
 0x57f   :  { %v807_v11 = vpack.c.bf16 %v806_v56, %v806_v56 }
 0x581   :  { %989 = vmatmul.msk.bf16.vlgmr.msrb.gmra.mxu1 %vm402_vm9, %v807_v11 }
 0x584   :  { %v1086_v13 = vpop.eup %1085 }
 0x585   :  { %v863_v16 = vmul.f32 %v1086_v13, %v1070_v36 }
 0x587   :  { %v864_v18 = vpack.c.bf16 %v863_v16, %v863_v16 }
 0x590   :  { %v866_v14 = vpop.permute.xlu0 %865 }
 0x591   :  { %v871_v17 = vsel %vm443_vm11, %v866_v14, 0 }
 0x592   :  { %880 = vmatpush.bf16.msra.mxu2 %v871_v17 }
 0x594   :  { %v456_v19 = vpop.f32.mrf.mxu2 }
 0x595   :  { %991 = vmatmul.msk.bf16.vlgmr.msra.gmra.mxu2 %vm402_vm9, %v864_v18 }
 0x598   :  { %v573_v10 = vpop.f32.mrf.mxu1 }
 0x59c   :  { %v458_v20 = vpop.f32.mrf.mxu2 }
 0x5a0   :  { %v575_v57 = vpop.f32.mrf.mxu1 }
 0x5a4   :  { %v516_v21 = vpop.f32.mrf.mxu2 }
 0x5ac   :  { %v518_v22 = vpop.f32.mrf.mxu2 }
 0x5cc   :  { %v708_v23 = vpop.f32.mrf.mxu1 }
 0x5d4   :  { %v710_v24 = vpop.f32.mrf.mxu1 }
 0x5da   :  { %v630_v25 = vpop.f32.mrf.mxu2 }
 0x5e2   :  { %v632_v26 = vpop.f32.mrf.mxu2 }
 0x5f2   :  { %v768_v15 = vpop.f32.mrf.mxu2 }
 0x5f3   :  { %v1037_v7 = vpack.i.bf16 %v768_v15, %v516_v21 }
 0x5f5   :  { %1038 = vrot.lane.b32.xlu0 %v1037_v7, %s1363_s22 }
 0x5fa   :  { %v770_v27 = vpop.f32.mrf.mxu2 }
 0x5fe   :  { %v825_v28 = vpop.f32.mrf.mxu1 }
 0x5ff   :  { %v1042_v29 = vpack.i.bf16 %v825_v28, %v573_v10 }
 0x601   :  { %1043 = vrot.lane.b32.xlu1 %v1042_v29, %s1364_s2 }
 0x606   :  { %v827_v30 = vpop.f32.mrf.mxu1 }
 0x618   :  { %v882_v31 = vpop.f32.mrf.mxu2 }
 0x619   :  { %v1047_v32 = vpack.i.bf16 %v882_v31, %v630_v25 }
 0x61b   :  { %1048 = vrot.lane.b32.xlu0 %v1047_v32, %s1365_s23 }
 0x620   :  { %v884_v33 = vpop.f32.mrf.mxu2 }
 0x667   :  { %v1039_v36 = vpop.permute.xlu0 %1038 }
 0x668   :  { %v1041_v38 = vunpack.i.h.bf16 %v1039_v36  ;;  %v1040_v39 = vunpack.i.l.bf16 %v1039_v36 }
 0x66a   :  { %v898_v43 = vsel %vm402_vm9, %v708_v23, %v1041_v38  ;;  %v646_v44 = vsel %vm402_vm9, %v456_v19, %v1040_v39 }
 0x673   :  { %v1044_v37 = vpop.permute.xlu1 %1043 }
 0x674   :  { %v1046_v40 = vunpack.i.h.bf16 %v1044_v37  ;;  %v1045_v41 = vunpack.i.l.bf16 %v1044_v37 }
 0x676   :  { %v648_v47 = vsel %vm647_vm12, %v646_v44, %v1045_v41  ;;  %v899_v48 = vsel %vm647_vm12, %v898_v43, %v1046_v40 }
 0x68d   :  { %v1049_v42 = vpop.permute.xlu0 %1048 }
 0x68e   :  { %v1051_v45 = vunpack.i.h.bf16 %v1049_v42  ;;  %v1050_v46 = vunpack.i.l.bf16 %v1049_v42 }
 0x690   :  { %v650_v49 = vsel %vm649_vm13, %v648_v47, %v1050_v46  ;;  %v900_v50 = vsel %vm649_vm13, %v899_v48, %v1051_v45 }
 0x691   :  { %v901_v51 = vpack.c.bf16 %v900_v50, %v650_v49 }
 0x693   :  { %1000 = vmatmul.msk.bf16.vlgmr.msra.gmra.mxu0 %vm200_vm0, %v901_v51 }
 0x710   :  { %v934_v53 = vpop.f32.mrf.mxu0 }
 0x711   :  { %v935_v54 = vadd.f32 %v1054_v52, %v934_v53 }
 0x713   :  { %v939_v55 = vpack.c.bf16 %v935_v54, %v935_v54 }
 0x715   :  { %942 = vst.msk [vmem:[#allocation17] sm:$0xf] %vm941_vm14, %v939_v55 }
 0x718   :  { %v936_v58 = vpop.f32.mrf.mxu0 }
 0x719   :  { %v937_v59 = vadd.f32 %v1054_v52, %v936_v58 }
 0x71b   :  { %v940_v60 = vpack.c.bf16 %v937_v59, %v937_v59 }
 0x71d   :  { %943 = vst.msk [vmem:[#allocation17 + $0x4] sm:$0xf] %vm941_vm14, %v940_v60 }
 0x71e   :  { %956 = dma.vmem_to_hbm [thread:$0]  %s949_s25, 128, %s951_s27, [#allocation4], %s1344_s17, %s1344_s17, %s1345_s18  }
 0x71f   :  { %1337 = dma.done.wait [#allocation4], 128  }
 0x720   :  { %1338 = vsyncadd [#allocation4], 4294967168 }
 0x721   :  { %961 = vsyncpa [#allocation3], 1 }
 0x722   :  { %962 = vsyncpa [#allocation6], 1 }
 0x723   :  { %963 = vsyncpa [#allocation9], 1 }
 0x724   :  { %964 = vsyncpa [#allocation12], 1 }
 0x725   :  { %965 = vsyncpa [#allocation15], 1 }
 0x726   :  { %966 = vsyncpa [#allocation4], 1 }

</bundles_post_ra>
